<compile_context>
chip_gen: v7x
topology: tpu7x:2x2x1
jax: 0.10.0
libtpu: 0.0.40
codegen_flags: <defaults>
</compile_context>

<pallas_src>
import functools
import math

import jax
import jax.numpy as jnp
from jax.experimental import pallas as pl
from jax.experimental.pallas import tpu as pltpu


def _round_up(n, m):
    return ((n + m - 1) // m) * m


def _pick_tile(n, pref, align):
    """Largest multiple of `align` that divides n and is <= min(pref, n)."""
    t = min(pref, n)
    t = max(align, (t // align) * align)
    while n % t != 0:
        t -= align
    return t


def _pad2(a, rows, cols):
    return jnp.pad(a, ((0, rows - a.shape[0]), (0, cols - a.shape[1])))


# ------------------- projection: support = x @ W (bf16 out) ------------------

def _proj_kernel(x_ref, w_ref, out_ref):
    out_ref[...] = jnp.dot(
        x_ref[...], w_ref[...], preferred_element_type=jnp.float32
    ).astype(out_ref.dtype)


def project(x_bf16, w_bf16, *, tp_pref=1024):
    """support = x @ W, row-tiled, bf16 output (f32 MXU accumulation)."""
    n, f_in = x_bf16.shape
    f_out = w_bf16.shape[1]
    tp = _pick_tile(n, tp_pref, 8)
    return pl.pallas_call(
        _proj_kernel,
        out_shape=jax.ShapeDtypeStruct((n, f_out), jnp.bfloat16),
        grid_spec=pltpu.PrefetchScalarGridSpec(
            num_scalar_prefetch=0,
            grid=(n // tp,),
            in_specs=[
                pl.BlockSpec((tp, f_in), lambda i: (i, 0)),      # x row tile
                pl.BlockSpec((f_in, f_out), lambda i: (0, 0)),   # W (resident)
            ],
            out_specs=pl.BlockSpec((tp, f_out), lambda i: (i, 0)),
        ),
        compiler_params=pltpu.CompilerParams(dimension_semantics=("parallel",)),
    )(x_bf16, w_bf16)


# ---------------- aggregation: relu(adj @ support + b), tiled ----------------

def _agg_kernel(s_ref, b_ref, adj_ref, out_ref, acc_ref):
    k = pl.program_id(1)

    @pl.when(k == 0)
    def _init():
        acc_ref[...] = jnp.zeros_like(acc_ref)

    acc_ref[...] += jnp.dot(
        adj_ref[...], s_ref[...], preferred_element_type=jnp.float32
    )

    @pl.when(k == pl.num_programs(1) - 1)
    def _finalize():
        y = jnp.maximum(acc_ref[...] + b_ref[...], 0.0)   # fused bias + ReLU
        out_ref[...] = y.astype(out_ref.dtype)


def aggregate(adj_bf16, support_bf16, b_f32, *, out_dtype,
              tm_pref=512, tk_pref=2048):
    """relu(adj @ support + b) with a resident f32 accumulator over k tiles."""
    n = adj_bf16.shape[0]
    f_out = support_bf16.shape[1]
    # Cap tm at n//2 so the "parallel" row axis has >=2 tiles (v7x megacore,
    # and keeps software pipelining alive even for small demo sizes).
    tm = _pick_tile(n, min(tm_pref, max(8, n // 2)), 8)
    tk = _pick_tile(n, tk_pref, 128)
    # TODO(synk): on v7x, adj could be streamed as fp8 (e4m3) for another ~2x
    # on the dominant HBM operand; kept bf16 here for cross-gen portability.
    return pl.pallas_call(
        _agg_kernel,
        out_shape=jax.ShapeDtypeStruct((n, f_out), out_dtype),
        grid_spec=pltpu.PrefetchScalarGridSpec(
            num_scalar_prefetch=0,
            grid=(n // tm, n // tk),
            in_specs=[
                pl.BlockSpec((tk, f_out), lambda i, k: (k, 0)),   # support tile
                pl.BlockSpec((1, f_out), lambda i, k: (0, 0)),    # bias (resident)
                pl.BlockSpec((tm, tk), lambda i, k: (i, k)),      # adj tile
            ],
            out_specs=pl.BlockSpec((tm, f_out), lambda i, k: (i, 0)),
            scratch_shapes=[pltpu.VMEM((tm, f_out), jnp.float32)],
        ),
        compiler_params=pltpu.CompilerParams(
            dimension_semantics=("parallel", "arbitrary"),
        ),
    )(support_bf16, b_f32, adj_bf16)


# ------------------------------ module forward -------------------------------

@jax.jit
def attribute_decoder_forward(x, adj, params):
    """Attribute_Decoder.forward (inference; F.dropout is identity)."""
    n, nhid = x.shape
    nfeat = params["w2"].shape[1]

    lane = 128
    n_pad = _round_up(n, lane)
    h_pad = _round_up(nhid, lane)      # padded hidden width (layer-1 out / layer-2 in)
    f_pad = _round_up(nfeat, lane)     # padded output feature width

    # One-time bf16 casts + zero padding (fused under jit; adj reused by both layers).
    adj_b = _pad2(adj, n_pad, n_pad).astype(jnp.bfloat16)
    x_b = _pad2(x, n_pad, nhid).astype(jnp.bfloat16)
    w1_b = _pad2(params["w1"], nhid, h_pad).astype(jnp.bfloat16)
    w2_b = _pad2(params["w2"], h_pad, f_pad).astype(jnp.bfloat16)
    b1 = jnp.pad(params["b1"], (0, h_pad - nhid)).reshape(1, h_pad).astype(jnp.float32)
    b2 = jnp.pad(params["b2"], (0, f_pad - nfeat)).reshape(1, f_pad).astype(jnp.float32)

    # Layer 1: h = relu(adj @ (x @ W1) + b1), emitted directly as bf16.
    s1 = project(x_b, w1_b)
    h = aggregate(adj_b, s1, b1, out_dtype=jnp.bfloat16)
    # TODO(synk): training-mode dropout (random masking via pltpu.prng_*) not implemented.
    # Layer 2: out = relu(adj @ (h @ W2) + b2), final output in f32.
    s2 = project(h, w2_b)
    out = aggregate(adj_b, s2, b2, out_dtype=jnp.float32)

    return out[:n, :nfeat]


def init_params(key, nfeat, nhid):
    k1, k2, k3, k4 = jax.random.split(key, 4)
    s1 = 1.0 / math.sqrt(nhid)
    return {
        "w1": jax.random.normal(k1, (nhid, nhid), jnp.float32) * s1,
        "b1": jax.random.normal(k2, (nhid,), jnp.float32) * 0.05,
        "w2": jax.random.normal(k3, (nhid, nfeat), jnp.float32) * s1,
        "b2": jax.random.normal(k4, (nfeat,), jnp.float32) * 0.05,
    }


if __name__ == "__main__":
    # Attribute_Decoder(nfeat, nhid, dropout): x is [N, nhid], output is [N, nfeat].
    N, nhid, nfeat = 512, 32, 64
    dropout = 0.5  # unused at inference

    key = jax.random.PRNGKey(0)
    key, kx, kadj = jax.random.split(key, 3)
    x = jax.random.normal(kx, (N, nhid), jnp.float32)

    # Random symmetric adjacency with self-loops, symmetrically normalized
    # (D^-1/2 (A+I) D^-1/2), like the usual GCN preprocessing.
    a = jax.random.bernoulli(kadj, 0.02, (N, N))
    a = jnp.logical_or(a, a.T)
    a = jnp.logical_or(a, jnp.eye(N, dtype=bool)).astype(jnp.float32)
    dinv = 1.0 / jnp.sqrt(jnp.sum(a, axis=1))
    adj = a * dinv[:, None] * dinv[None, :]

    params = init_params(key, nfeat, nhid)

    out = attribute_decoder_forward(x, adj, params)
    out = jax.block_until_ready(out)

    # Pure-JAX f32 reference of the module's forward pass.
    ref1 = jnp.maximum(adj @ (x @ params["w1"]) + params["b1"], 0.0)
    ref = jnp.maximum(adj @ (ref1 @ params["w2"]) + params["b2"], 0.0)

    assert out.shape == (N, nfeat)
    assert bool(jnp.all(jnp.isfinite(out)))
    assert bool(jnp.all(out >= 0.0))                        # ReLU output
    max_err = float(jnp.max(jnp.abs(out - ref)))
    assert max_err < 5e-2, f"max abs err {max_err} vs f32 reference (bf16 matmuls)"
    print("KERNEL_OK")
</pallas_src>

<mosaic_0001>
module attributes {stable_mosaic.version = 11 : i64} {
  func.func @_proj_kernel(%arg0: i32, %arg1: memref<512x32xbf16, #tpu.memory_space<vmem>>, %arg2: memref<32x128xbf16, #tpu.memory_space<vmem>>, %arg3: memref<512x128xbf16, #tpu.memory_space<vmem>>) attributes {dimension_semantics = [#tpu.dimension_semantics<parallel>], iteration_bounds = array<i64: 1>, scalar_prefetch = 0 : i64, scratch_operands = 0 : i64, tpu.core_type = #tpu.core_type<tc>, window_params = [{transform_indices = @transform_0, window_bounds = array<i64: 512, 32>}, {pipeline_mode = #tpu.pipeline_mode<synchronous>, transform_indices = @transform_1, window_bounds = array<i64: 32, 128>}, {transform_indices = @transform_2, window_bounds = array<i64: 512, 128>}]} {
    %c0 = arith.constant 0 : index
    %c0_0 = arith.constant 0 : index
    %0 = vector.load %arg1[%c0, %c0_0] : memref<512x32xbf16, #tpu.memory_space<vmem>>, vector<512x32xbf16>
    %c0_1 = arith.constant 0 : index
    %c0_2 = arith.constant 0 : index
    %1 = vector.load %arg2[%c0_1, %c0_2] : memref<32x128xbf16, #tpu.memory_space<vmem>>, vector<32x128xbf16>
    %cst = arith.constant dense<0.000000e+00> : vector<512x128xf32>
    %2 = tpu.matmul %0, %1, %cst {dimension_numbers = #tpu.dot_dimension_numbers<[1], [0], [0], [1], [0, 0, 1, 1], [], []>} : vector<512x32xbf16>, vector<32x128xbf16>, vector<512x128xf32> -> vector<512x128xf32>
    %3 = arith.truncf %2 : vector<512x128xf32> to vector<512x128xbf16>
    %c0_3 = arith.constant 0 : index
    %c0_4 = arith.constant 0 : index
    %4 = vector.load %arg3[%c0_3, %c0_4] : memref<512x128xbf16, #tpu.memory_space<vmem>>, vector<512x128xbf16>
    tpu.vector_store %arg3[%c0_3, %c0_4], %3 {strides = array<i32>} : memref<512x128xbf16, #tpu.memory_space<vmem>>, vector<512x128xbf16>,
    return
  }
  func.func @transform_0(%arg0: i32) -> (i32, i32) {
    %c0_i32 = arith.constant 0 : i32
    %c0_i32_0 = arith.constant 0 : i32
    return %arg0, %c0_i32 : i32, i32
  }
  func.func @transform_1(%arg0: i32) -> (i32, i32) {
    %c0_i32 = arith.constant 0 : i32
    %c0_i32_0 = arith.constant 0 : i32
    %c0_i32_1 = arith.constant 0 : i32
    return %c0_i32, %c0_i32_0 : i32, i32
  }
  func.func @transform_2(%arg0: i32) -> (i32, i32) {
    %c0_i32 = arith.constant 0 : i32
    %c0_i32_0 = arith.constant 0 : i32
    return %arg0, %c0_i32 : i32, i32
  }
}

module attributes {stable_mosaic.version = 11 : i64} {
  func.func @_agg_kernel(%arg0: i32, %arg1: i32, %arg2: memref<512x128xbf16, #tpu.memory_space<vmem>>, %arg3: memref<1x128xf32, #tpu.memory_space<vmem>>, %arg4: memref<256x512xbf16, #tpu.memory_space<vmem>>, %arg5: memref<256x128xbf16, #tpu.memory_space<vmem>>, %arg6: memref<256x128xf32, #tpu.memory_space<vmem>>) attributes {dimension_semantics = [#tpu.dimension_semantics<parallel>, #tpu.dimension_semantics<arbitrary>], iteration_bounds = array<i64: 2, 1>, scalar_prefetch = 0 : i64, scratch_operands = 1 : i64, tpu.core_type = #tpu.core_type<tc>, window_params = [{transform_indices = @transform_0, window_bounds = array<i64: 512, 128>}, {pipeline_mode = #tpu.pipeline_mode<synchronous>, transform_indices = @transform_1, window_bounds = array<i64: 1, 128>}, {transform_indices = @transform_2, window_bounds = array<i64: 256, 512>}, {transform_indices = @transform_3, window_bounds = array<i64: 256, 128>}]} {
    %c0_i32 = arith.constant 0 : i32
    %0 = arith.cmpi eq, %arg1, %c0_i32 : i32
    %1 = arith.extui %0 : i1 to i32
    %c0_i32_0 = arith.constant 0 : i32
    %2 = arith.cmpi ne, %1, %c0_i32_0 : i32
    scf.if %2 {
      %cst_10 = arith.constant 0.000000e+00 : f32
      %12 = vector.broadcast %cst_10 : f32 to vector<256x128xf32>
      %c0_11 = arith.constant 0 : index
      %c0_12 = arith.constant 0 : index
      %13 = vector.load %arg6[%c0_11, %c0_12] : memref<256x128xf32, #tpu.memory_space<vmem>>, vector<256x128xf32>
      tpu.vector_store %arg6[%c0_11, %c0_12], %12 {strides = array<i32>} : memref<256x128xf32, #tpu.memory_space<vmem>>, vector<256x128xf32>,
    } else {
    }
    %c0 = arith.constant 0 : index
    %c0_1 = arith.constant 0 : index
    %3 = vector.load %arg6[%c0, %c0_1] : memref<256x128xf32, #tpu.memory_space<vmem>>, vector<256x128xf32>
    %c0_2 = arith.constant 0 : index
    %c0_3 = arith.constant 0 : index
    %4 = vector.load %arg4[%c0_2, %c0_3] : memref<256x512xbf16, #tpu.memory_space<vmem>>, vector<256x512xbf16>
    %c0_4 = arith.constant 0 : index
    %c0_5 = arith.constant 0 : index
    %5 = vector.load %arg2[%c0_4, %c0_5] : memref<512x128xbf16, #tpu.memory_space<vmem>>, vector<512x128xbf16>
    %cst = arith.constant dense<0.000000e+00> : vector<256x128xf32>
    %6 = tpu.matmul %4, %5, %cst {dimension_numbers = #tpu.dot_dimension_numbers<[1], [0], [0], [1], [0, 0, 1, 1], [], []>} : vector<256x512xbf16>, vector<512x128xbf16>, vector<256x128xf32> -> vector<256x128xf32>
    %7 = arith.addf %3, %6 : vector<256x128xf32>
    %c0_6 = arith.constant 0 : index
    %c0_7 = arith.constant 0 : index
    %8 = vector.load %arg6[%c0_6, %c0_7] : memref<256x128xf32, #tpu.memory_space<vmem>>, vector<256x128xf32>
    tpu.vector_store %arg6[%c0_6, %c0_7], %7 {strides = array<i32>} : memref<256x128xf32, #tpu.memory_space<vmem>>, vector<256x128xf32>,
    %c0_i32_8 = arith.constant 0 : i32
    %9 = arith.cmpi eq, %arg1, %c0_i32_8 : i32
    %10 = arith.extui %9 : i1 to i32
    %c0_i32_9 = arith.constant 0 : i32
    %11 = arith.cmpi ne, %10, %c0_i32_9 : i32
    scf.if %11 {
      %c0_10 = arith.constant 0 : index
      %c0_11 = arith.constant 0 : index
      %12 = vector.load %arg6[%c0_10, %c0_11] : memref<256x128xf32, #tpu.memory_space<vmem>>, vector<256x128xf32>
      %c0_12 = arith.constant 0 : index
      %c0_13 = arith.constant 0 : index
      %13 = vector.load %arg3[%c0_12, %c0_13] : memref<1x128xf32, #tpu.memory_space<vmem>>, vector<1x128xf32>
      %14 = vector.broadcast %13 : vector<1x128xf32> to vector<256x128xf32>
      %15 = arith.addf %12, %14 : vector<256x128xf32>
      %cst_14 = arith.constant 0.000000e+00 : f32
      %16 = vector.broadcast %cst_14 : f32 to vector<256x128xf32>
      %17 = arith.maximumf %15, %16 : vector<256x128xf32>
      %18 = arith.truncf %17 : vector<256x128xf32> to vector<256x128xbf16>
      %c0_15 = arith.constant 0 : index
      %c0_16 = arith.constant 0 : index
      %19 = vector.load %arg5[%c0_15, %c0_16] : memref<256x128xbf16, #tpu.memory_space<vmem>>, vector<256x128xbf16>
      tpu.vector_store %arg5[%c0_15, %c0_16], %18 {strides = array<i32>} : memref<256x128xbf16, #tpu.memory_space<vmem>>, vector<256x128xbf16>,
    } else {
    }
    return
  }
  func.func @transform_0(%arg0: i32, %arg1: i32) -> (i32, i32) {
    %c0_i32 = arith.constant 0 : i32
    %c0_i32_0 = arith.constant 0 : i32
    return %arg1, %c0_i32 : i32, i32
  }
  func.func @transform_1(%arg0: i32, %arg1: i32) -> (i32, i32) {
    %c0_i32 = arith.constant 0 : i32
    %c0_i32_0 = arith.constant 0 : i32
    %c0_i32_1 = arith.constant 0 : i32
    return %c0_i32, %c0_i32_0 : i32, i32
  }
  func.func @transform_2(%arg0: i32, %arg1: i32) -> (i32, i32) {
    %c0_i32 = arith.constant 0 : i32
    return %arg0, %arg1 : i32, i32
  }
  func.func @transform_3(%arg0: i32, %arg1: i32) -> (i32, i32) {
    %c0_i32 = arith.constant 0 : i32
    %c0_i32_0 = arith.constant 0 : i32
    return %arg0, %c0_i32 : i32, i32
  }
}

module attributes {stable_mosaic.version = 11 : i64} {
  func.func @_proj_kernel(%arg0: i32, %arg1: memref<512x128xbf16, #tpu.memory_space<vmem>>, %arg2: memref<128x128xbf16, #tpu.memory_space<vmem>>, %arg3: memref<512x128xbf16, #tpu.memory_space<vmem>>) attributes {dimension_semantics = [#tpu.dimension_semantics<parallel>], iteration_bounds = array<i64: 1>, scalar_prefetch = 0 : i64, scratch_operands = 0 : i64, tpu.core_type = #tpu.core_type<tc>, window_params = [{transform_indices = @transform_0, window_bounds = array<i64: 512, 128>}, {pipeline_mode = #tpu.pipeline_mode<synchronous>, transform_indices = @transform_1, window_bounds = array<i64: 128, 128>}, {transform_indices = @transform_2, window_bounds = array<i64: 512, 128>}]} {
    %c0 = arith.constant 0 : index
    %c0_0 = arith.constant 0 : index
    %0 = vector.load %arg1[%c0, %c0_0] : memref<512x128xbf16, #tpu.memory_space<vmem>>, vector<512x128xbf16>
    %c0_1 = arith.constant 0 : index
    %c0_2 = arith.constant 0 : index
    %1 = vector.load %arg2[%c0_1, %c0_2] : memref<128x128xbf16, #tpu.memory_space<vmem>>, vector<128x128xbf16>
    %cst = arith.constant dense<0.000000e+00> : vector<512x128xf32>
    %2 = tpu.matmul %0, %1, %cst {dimension_numbers = #tpu.dot_dimension_numbers<[1], [0], [0], [1], [0, 0, 1, 1], [], []>} : vector<512x128xbf16>, vector<128x128xbf16>, vector<512x128xf32> -> vector<512x128xf32>
    %3 = arith.truncf %2 : vector<512x128xf32> to vector<512x128xbf16>
    %c0_3 = arith.constant 0 : index
    %c0_4 = arith.constant 0 : index
    %4 = vector.load %arg3[%c0_3, %c0_4] : memref<512x128xbf16, #tpu.memory_space<vmem>>, vector<512x128xbf16>
    tpu.vector_store %arg3[%c0_3, %c0_4], %3 {strides = array<i32>} : memref<512x128xbf16, #tpu.memory_space<vmem>>, vector<512x128xbf16>,
    return
  }
  func.func @transform_0(%arg0: i32) -> (i32, i32) {
    %c0_i32 = arith.constant 0 : i32
    %c0_i32_0 = arith.constant 0 : i32
    return %arg0, %c0_i32 : i32, i32
  }
  func.func @transform_1(%arg0: i32) -> (i32, i32) {
    %c0_i32 = arith.constant 0 : i32
    %c0_i32_0 = arith.constant 0 : i32
    %c0_i32_1 = arith.constant 0 : i32
    return %c0_i32, %c0_i32_0 : i32, i32
  }
  func.func @transform_2(%arg0: i32) -> (i32, i32) {
    %c0_i32 = arith.constant 0 : i32
    %c0_i32_0 = arith.constant 0 : i32
    return %arg0, %c0_i32 : i32, i32
  }
}

module attributes {stable_mosaic.version = 11 : i64} {
  func.func @_agg_kernel(%arg0: i32, %arg1: i32, %arg2: memref<512x128xbf16, #tpu.memory_space<vmem>>, %arg3: memref<1x128xf32, #tpu.memory_space<vmem>>, %arg4: memref<256x512xbf16, #tpu.memory_space<vmem>>, %arg5: memref<256x128xf32, #tpu.memory_space<vmem>>, %arg6: memref<256x128xf32, #tpu.memory_space<vmem>>) attributes {dimension_semantics = [#tpu.dimension_semantics<parallel>, #tpu.dimension_semantics<arbitrary>], iteration_bounds = array<i64: 2, 1>, scalar_prefetch = 0 : i64, scratch_operands = 1 : i64, tpu.core_type = #tpu.core_type<tc>, window_params = [{transform_indices = @transform_0, window_bounds = array<i64: 512, 128>}, {pipeline_mode = #tpu.pipeline_mode<synchronous>, transform_indices = @transform_1, window_bounds = array<i64: 1, 128>}, {transform_indices = @transform_2, window_bounds = array<i64: 256, 512>}, {transform_indices = @transform_3, window_bounds = array<i64: 256, 128>}]} {
    %c0_i32 = arith.constant 0 : i32
    %0 = arith.cmpi eq, %arg1, %c0_i32 : i32
    %1 = arith.extui %0 : i1 to i32
    %c0_i32_0 = arith.constant 0 : i32
    %2 = arith.cmpi ne, %1, %c0_i32_0 : i32
    scf.if %2 {
      %cst_10 = arith.constant 0.000000e+00 : f32
      %12 = vector.broadcast %cst_10 : f32 to vector<256x128xf32>
      %c0_11 = arith.constant 0 : index
      %c0_12 = arith.constant 0 : index
      %13 = vector.load %arg6[%c0_11, %c0_12] : memref<256x128xf32, #tpu.memory_space<vmem>>, vector<256x128xf32>
      tpu.vector_store %arg6[%c0_11, %c0_12], %12 {strides = array<i32>} : memref<256x128xf32, #tpu.memory_space<vmem>>, vector<256x128xf32>,
    } else {
    }
    %c0 = arith.constant 0 : index
    %c0_1 = arith.constant 0 : index
    %3 = vector.load %arg6[%c0, %c0_1] : memref<256x128xf32, #tpu.memory_space<vmem>>, vector<256x128xf32>
    %c0_2 = arith.constant 0 : index
    %c0_3 = arith.constant 0 : index
    %4 = vector.load %arg4[%c0_2, %c0_3] : memref<256x512xbf16, #tpu.memory_space<vmem>>, vector<256x512xbf16>
    %c0_4 = arith.constant 0 : index
    %c0_5 = arith.constant 0 : index
    %5 = vector.load %arg2[%c0_4, %c0_5] : memref<512x128xbf16, #tpu.memory_space<vmem>>, vector<512x128xbf16>
    %cst = arith.constant dense<0.000000e+00> : vector<256x128xf32>
    %6 = tpu.matmul %4, %5, %cst {dimension_numbers = #tpu.dot_dimension_numbers<[1], [0], [0], [1], [0, 0, 1, 1], [], []>} : vector<256x512xbf16>, vector<512x128xbf16>, vector<256x128xf32> -> vector<256x128xf32>
    %7 = arith.addf %3, %6 : vector<256x128xf32>
    %c0_6 = arith.constant 0 : index
    %c0_7 = arith.constant 0 : index
    %8 = vector.load %arg6[%c0_6, %c0_7] : memref<256x128xf32, #tpu.memory_space<vmem>>, vector<256x128xf32>
    tpu.vector_store %arg6[%c0_6, %c0_7], %7 {strides = array<i32>} : memref<256x128xf32, #tpu.memory_space<vmem>>, vector<256x128xf32>,
    %c0_i32_8 = arith.constant 0 : i32
    %9 = arith.cmpi eq, %arg1, %c0_i32_8 : i32
    %10 = arith.extui %9 : i1 to i32
    %c0_i32_9 = arith.constant 0 : i32
    %11 = arith.cmpi ne, %10, %c0_i32_9 : i32
    scf.if %11 {
      %c0_10 = arith.constant 0 : index
      %c0_11 = arith.constant 0 : index
      %12 = vector.load %arg6[%c0_10, %c0_11] : memref<256x128xf32, #tpu.memory_space<vmem>>, vector<256x128xf32>
      %c0_12 = arith.constant 0 : index
      %c0_13 = arith.constant 0 : index
      %13 = vector.load %arg3[%c0_12, %c0_13] : memref<1x128xf32, #tpu.memory_space<vmem>>, vector<1x128xf32>
      %14 = vector.broadcast %13 : vector<1x128xf32> to vector<256x128xf32>
      %15 = arith.addf %12, %14 : vector<256x128xf32>
      %cst_14 = arith.constant 0.000000e+00 : f32
      %16 = vector.broadcast %cst_14 : f32 to vector<256x128xf32>
      %17 = arith.maximumf %15, %16 : vector<256x128xf32>
      %c0_15 = arith.constant 0 : index
      %c0_16 = arith.constant 0 : index
      %18 = vector.load %arg5[%c0_15, %c0_16] : memref<256x128xf32, #tpu.memory_space<vmem>>, vector<256x128xf32>
      tpu.vector_store %arg5[%c0_15, %c0_16], %17 {strides = array<i32>} : memref<256x128xf32, #tpu.memory_space<vmem>>, vector<256x128xf32>,
    } else {
    }
    return
  }
  func.func @transform_0(%arg0: i32, %arg1: i32) -> (i32, i32) {
    %c0_i32 = arith.constant 0 : i32
    %c0_i32_0 = arith.constant 0 : i32
    return %arg1, %c0_i32 : i32, i32
  }
  func.func @transform_1(%arg0: i32, %arg1: i32) -> (i32, i32) {
    %c0_i32 = arith.constant 0 : i32
    %c0_i32_0 = arith.constant 0 : i32
    %c0_i32_1 = arith.constant 0 : i32
    return %c0_i32, %c0_i32_0 : i32, i32
  }
  func.func @transform_2(%arg0: i32, %arg1: i32) -> (i32, i32) {
    %c0_i32 = arith.constant 0 : i32
    return %arg0, %arg1 : i32, i32
  }
  func.func @transform_3(%arg0: i32, %arg1: i32) -> (i32, i32) {
    %c0_i32 = arith.constant 0 : i32
    %c0_i32_0 = arith.constant 0 : i32
    return %arg0, %c0_i32 : i32, i32
  }
}

</mosaic_0001>

<bundles_post_ra>
// kernel: attribute_decoder_forward.4
= control target key start
LH: loop header
LB: loop body
LE: loop exit
PB: predicated region body
PF: predicated region fallthrough
CT: control target
= control target key end

     0   :  { %vm252_vm0 = vcmask 261120   ;;  %s1732_s1 = inlined_call_operand.vmem [shape: bf16[32,128], index: 1, kind: input, shape index: {}]   ;;  %s1733_s0 = inlined_call_operand.vmem [shape: bf16[512,32], index: 0, kind: input, shape index: {}]   ;;  %s1734_s2 = inlined_call_operand.vmem [shape: bf16[512,128], index: 2, kind: output, shape index: {}]  }
   0x1   :  { %v1453_v0 = vld [vmem:[%s1732_s1] sm:$0xff]   ;;  %v1454_v1 = vld [vmem:[%s1732_s1 + $0x8] sm:$0xff]   ;;  %v1459_v6 = vld [vmem:[%s1733_s0 + $0x10] sm:$0xff]  }
   0x2   :  { %1381 = vmatprep.subr.bf16.mxu0 %v1453_v0  ;;  %1449 = vmatprep.subr.bf16.mxu1 %v1453_v0  ;;  %v1455_v2 = vld [vmem:[%s1733_s0] sm:$0xff]   ;;  %v1457_v4 = vld [vmem:[%s1733_s0 + $0x8] sm:$0xff]   ;;  %v1460_v7 = vld [vmem:[%s1733_s0 + $0x90] sm:$0xff]  }
   0x3   :  { %1382 = vmatpush3.bf16.msra.mxu0 %v1453_v0  ;;  %1451 = vmatpush3.bf16.msra.mxu1 %v1453_v0  ;;  %v1456_v3 = vld [vmem:[%s1733_s0 + $0x80] sm:$0xff]   ;;  %v1458_v5 = vld [vmem:[%s1733_s0 + $0x88] sm:$0xff]   ;;  %v1461_v8 = vld [vmem:[%s1733_s0 + $0x18] sm:$0xff]  }
   0x4   :  { %1383 = vmatprep.subr.bf16.mxu0 %v1454_v1  ;;  %1450 = vmatprep.subr.bf16.mxu1 %v1454_v1  ;;  %v1462_v9 = vld [vmem:[%s1733_s0 + $0x98] sm:$0xff]   ;;  %v1463_v10 = vld [vmem:[%s1733_s0 + $0x20] sm:$0xff]   ;;  %v1465_v12 = vld [vmem:[%s1733_s0 + $0x28] sm:$0xff]  }
   0x5   :  { %1385 = vmatprep.mubr.msk.bf16.mxu0 %vm252_vm0, %v1455_v2  ;;  %1417 = vmatprep.mubr.msk.bf16.mxu1 %vm252_vm0, %v1456_v3  ;;  %v1464_v11 = vld [vmem:[%s1733_s0 + $0xa0] sm:$0xff]   ;;  %v1466_v13 = vld [vmem:[%s1733_s0 + $0xa8] sm:$0xff]   ;;  %v1467_v14 = vld [vmem:[%s1733_s0 + $0x30] sm:$0xff]  }
   0x6   :  { %v1468_v15 = vld [vmem:[%s1733_s0 + $0xb0] sm:$0xff]   ;;  %v1469_v16 = vld [vmem:[%s1733_s0 + $0x38] sm:$0xff]   ;;  %v1471_v18 = vld [vmem:[%s1733_s0 + $0x40] sm:$0xff]  }
   0x7   :  { %1384 = vmatpush3.bf16.msra.mxu0 %v1454_v1  ;;  %1452 = vmatpush3.bf16.msra.mxu1 %v1454_v1  ;;  %v1470_v17 = vld [vmem:[%s1733_s0 + $0xb8] sm:$0xff]   ;;  %v1472_v19 = vld [vmem:[%s1733_s0 + $0xc0] sm:$0xff]   ;;  %v1473_v20 = vld [vmem:[%s1733_s0 + $0x48] sm:$0xff]  }
   0x8   :  { %v1474_v21 = vld [vmem:[%s1733_s0 + $0xc8] sm:$0xff]   ;;  %v1475_v22 = vld [vmem:[%s1733_s0 + $0x50] sm:$0xff]   ;;  %v1477_v24 = vld [vmem:[%s1733_s0 + $0x58] sm:$0xff]  }
   0x9   :  { %v1476_v23 = vld [vmem:[%s1733_s0 + $0xd0] sm:$0xff]   ;;  %v1478_v25 = vld [vmem:[%s1733_s0 + $0xd8] sm:$0xff]   ;;  %v1479_v26 = vld [vmem:[%s1733_s0 + $0x60] sm:$0xff]  }
   0xa   :  { %1386 = vmatmul.mubr.msk.bf16.vlgmr.msra.gmra.mrb[0].mxu0 %vm252_vm0, %v1457_v4  ;;  %1418 = vmatmul.mubr.msk.bf16.vlgmr.msra.gmra.mrb[0].mxu1 %vm252_vm0, %v1458_v5  ;;  %v1480_v27 = vld [vmem:[%s1733_s0 + $0xe0] sm:$0xff]   ;;  %v1481_v28 = vld [vmem:[%s1733_s0 + $0x68] sm:$0xff]   ;;  %v1483_v30 = vld [vmem:[%s1733_s0 + $0x70] sm:$0xff]  }
   0xb   :  { %1389 = vmatprep.mubr.msk.bf16.mxu0 %vm252_vm0, %v1459_v6  ;;  %1421 = vmatprep.mubr.msk.bf16.mxu1 %vm252_vm0, %v1460_v7  ;;  %v1482_v29 = vld [vmem:[%s1733_s0 + $0xe8] sm:$0xff]   ;;  %v1484_v31 = vld [vmem:[%s1733_s0 + $0xf0] sm:$0xff]   ;;  %v1485_v32 = vld [vmem:[%s1733_s0 + $0x78] sm:$0xff]  }
   0xc   :  { %v1486_v33 = vld [vmem:[%s1733_s0 + $0xf8] sm:$0xff]  }
  0x12   :  { %1390 = vmatmul.mubr.msk.bf16.gmra.mrb[4].mxu0 %vm252_vm0, %v1461_v8  ;;  %1422 = vmatmul.mubr.msk.bf16.gmra.mrb[4].mxu1 %vm252_vm0, %v1462_v9 }
  0x13   :  { %1393 = vmatprep.mubr.msk.bf16.mxu0 %vm252_vm0, %v1463_v10  ;;  %1425 = vmatprep.mubr.msk.bf16.mxu1 %vm252_vm0, %v1464_v11 }
  0x1a   :  { %1394 = vmatmul.mubr.msk.bf16.gmra.mrb[8].mxu0 %vm252_vm0, %v1465_v12  ;;  %1426 = vmatmul.mubr.msk.bf16.gmra.mrb[8].mxu1 %vm252_vm0, %v1466_v13 }
  0x1b   :  { %1397 = vmatprep.mubr.msk.bf16.mxu0 %vm252_vm0, %v1467_v14  ;;  %1429 = vmatprep.mubr.msk.bf16.mxu1 %vm252_vm0, %v1468_v15 }
  0x22   :  { %1398 = vmatmul.mubr.msk.bf16.gmra.mrb[12].mxu0 %vm252_vm0, %v1469_v16  ;;  %1430 = vmatmul.mubr.msk.bf16.gmra.mrb[12].mxu1 %vm252_vm0, %v1470_v17 }
  0x23   :  { %1401 = vmatprep.mubr.msk.bf16.mxu0 %vm252_vm0, %v1471_v18  ;;  %1433 = vmatprep.mubr.msk.bf16.mxu1 %vm252_vm0, %v1472_v19 }
  0x2a   :  { %1402 = vmatmul.mubr.msk.bf16.gmra.mrb[16].mxu0 %vm252_vm0, %v1473_v20  ;;  %1434 = vmatmul.mubr.msk.bf16.gmra.mrb[16].mxu1 %vm252_vm0, %v1474_v21 }
  0x2b   :  { %1405 = vmatprep.mubr.msk.bf16.mxu0 %vm252_vm0, %v1475_v22  ;;  %1437 = vmatprep.mubr.msk.bf16.mxu1 %vm252_vm0, %v1476_v23 }
  0x32   :  { %1406 = vmatmul.mubr.msk.bf16.gmra.mrb[20].mxu0 %vm252_vm0, %v1477_v24  ;;  %1438 = vmatmul.mubr.msk.bf16.gmra.mrb[20].mxu1 %vm252_vm0, %v1478_v25 }
  0x33   :  { %1409 = vmatprep.mubr.msk.bf16.mxu0 %vm252_vm0, %v1479_v26  ;;  %1441 = vmatprep.mubr.msk.bf16.mxu1 %vm252_vm0, %v1480_v27 }
  0x3a   :  { %1410 = vmatmul.mubr.msk.bf16.gmra.mrb[24].mxu0 %vm252_vm0, %v1481_v28  ;;  %1442 = vmatmul.mubr.msk.bf16.gmra.mrb[24].mxu1 %vm252_vm0, %v1482_v29 }
  0x3b   :  { %1413 = vmatprep.mubr.msk.bf16.mxu0 %vm252_vm0, %v1483_v30  ;;  %1445 = vmatprep.mubr.msk.bf16.mxu1 %vm252_vm0, %v1484_v31 }
  0x42   :  { %1414 = vmatmul.mubr.msk.bf16.gmra.mrb[28].mxu0 %vm252_vm0, %v1485_v32  ;;  %1446 = vmatmul.mubr.msk.bf16.gmra.mrb[28].mxu1 %vm252_vm0, %v1486_v33 }
  0xdd   :  { %v1387_v34 = vpop.f32.mrb[0].mxu0  ;;  %v1419_v35 = vpop.f32.mrb[0].mxu1 }
  0xde   :  { %v383_v36 = vpop.f32.mrb[1].mxu0  ;;  %v511_v37 = vpop.f32.mrb[1].mxu1 }
  0xdf   :  { %v1388_v38 = vpop.f32.mrb[2].mxu0  ;;  %v1420_v39 = vpop.f32.mrb[2].mxu1 }
  0xe0   :  { %v1164_v40 = vpack.c.bf16 %v1388_v38, %v1387_v34  ;;  %v1244_v41 = vpack.c.bf16 %v1420_v39, %v1419_v35  ;;  %v386_v42 = vpop.f32.mrb[3].mxu0  ;;  %v514_v43 = vpop.f32.mrb[3].mxu1 }
  0xe1   :  { %v1159_v44 = vpack.c.bf16 %v386_v42, %v383_v36  ;;  %v1239_v45 = vpack.c.bf16 %v514_v43, %v511_v37 }
  0xe2   :  { %1316 = vst [vmem:[%s1734_s2 + $0x8] sm:$0xff] %v1164_v40   ;;  %1332 = vst [vmem:[%s1734_s2 + $0x88] sm:$0xff] %v1244_v41  }
  0xe3   :  { %1160 = vst [vmem:[%s1734_s2] sm:$0xff] %v1159_v44   ;;  %1331 = vst [vmem:[%s1734_s2 + $0x80] sm:$0xff] %v1239_v45  }
  0xe5   :  { %v1391_v46 = vpop.f32.mrb[4].mxu0  ;;  %v1423_v47 = vpop.f32.mrb[4].mxu1 }
  0xe6   :  { %v399_v48 = vpop.f32.mrb[5].mxu0  ;;  %v527_v49 = vpop.f32.mrb[5].mxu1 }
  0xe7   :  { %v1392_v50 = vpop.f32.mrb[6].mxu0  ;;  %v1424_v51 = vpop.f32.mrb[6].mxu1 }
  0xe8   :  { %v1174_v52 = vpack.c.bf16 %v1392_v50, %v1391_v46  ;;  %v1254_v53 = vpack.c.bf16 %v1424_v51, %v1423_v47  ;;  %v402_v54 = vpop.f32.mrb[7].mxu0  ;;  %v530_v55 = vpop.f32.mrb[7].mxu1 }
  0xe9   :  { %v1169_v56 = vpack.c.bf16 %v402_v54, %v399_v48  ;;  %v1249_v57 = vpack.c.bf16 %v530_v55, %v527_v49 }
  0xea   :  { %1318 = vst [vmem:[%s1734_s2 + $0x18] sm:$0xff] %v1174_v52   ;;  %1334 = vst [vmem:[%s1734_s2 + $0x98] sm:$0xff] %v1254_v53  }
  0xeb   :  { %1317 = vst [vmem:[%s1734_s2 + $0x10] sm:$0xff] %v1169_v56   ;;  %1333 = vst [vmem:[%s1734_s2 + $0x90] sm:$0xff] %v1249_v57  }
  0xed   :  { %v1395_v58 = vpop.f32.mrb[8].mxu0  ;;  %v1427_v59 = vpop.f32.mrb[8].mxu1 }
  0xee   :  { %v415_v60 = vpop.f32.mrb[9].mxu0  ;;  %v543_v61 = vpop.f32.mrb[9].mxu1 }
  0xef   :  { %v1396_v62 = vpop.f32.mrb[10].mxu0  ;;  %v1428_v63 = vpop.f32.mrb[10].mxu1 }
  0xf0   :  { %v1184_v0 = vpack.c.bf16 %v1396_v62, %v1395_v58  ;;  %v1264_v1 = vpack.c.bf16 %v1428_v63, %v1427_v59  ;;  %v418_v2 = vpop.f32.mrb[11].mxu0  ;;  %v546_v3 = vpop.f32.mrb[11].mxu1 }
  0xf1   :  { %v1179_v4 = vpack.c.bf16 %v418_v2, %v415_v60  ;;  %v1259_v5 = vpack.c.bf16 %v546_v3, %v543_v61 }
  0xf2   :  { %1320 = vst [vmem:[%s1734_s2 + $0x28] sm:$0xff] %v1184_v0   ;;  %1336 = vst [vmem:[%s1734_s2 + $0xa8] sm:$0xff] %v1264_v1  }
  0xf3   :  { %1319 = vst [vmem:[%s1734_s2 + $0x20] sm:$0xff] %v1179_v4   ;;  %1335 = vst [vmem:[%s1734_s2 + $0xa0] sm:$0xff] %v1259_v5  }
  0xf5   :  { %v1399_v6 = vpop.f32.mrb[12].mxu0  ;;  %v1431_v7 = vpop.f32.mrb[12].mxu1 }
  0xf6   :  { %v431_v8 = vpop.f32.mrb[13].mxu0  ;;  %v559_v9 = vpop.f32.mrb[13].mxu1 }
  0xf7   :  { %v1400_v10 = vpop.f32.mrb[14].mxu0  ;;  %v1432_v11 = vpop.f32.mrb[14].mxu1 }
  0xf8   :  { %v1194_v12 = vpack.c.bf16 %v1400_v10, %v1399_v6  ;;  %v1274_v13 = vpack.c.bf16 %v1432_v11, %v1431_v7  ;;  %v434_v14 = vpop.f32.mrb[15].mxu0  ;;  %v562_v15 = vpop.f32.mrb[15].mxu1 }
  0xf9   :  { %v1189_v16 = vpack.c.bf16 %v434_v14, %v431_v8  ;;  %v1269_v17 = vpack.c.bf16 %v562_v15, %v559_v9 }
  0xfa   :  { %1322 = vst [vmem:[%s1734_s2 + $0x38] sm:$0xff] %v1194_v12   ;;  %1338 = vst [vmem:[%s1734_s2 + $0xb8] sm:$0xff] %v1274_v13  }
  0xfb   :  { %1321 = vst [vmem:[%s1734_s2 + $0x30] sm:$0xff] %v1189_v16   ;;  %1337 = vst [vmem:[%s1734_s2 + $0xb0] sm:$0xff] %v1269_v17  }
  0xfd   :  { %v1403_v18 = vpop.f32.mrb[16].mxu0  ;;  %v1435_v19 = vpop.f32.mrb[16].mxu1 }
  0xfe   :  { %v447_v20 = vpop.f32.mrb[17].mxu0  ;;  %v575_v21 = vpop.f32.mrb[17].mxu1 }
  0xff   :  { %v1404_v22 = vpop.f32.mrb[18].mxu0  ;;  %v1436_v23 = vpop.f32.mrb[18].mxu1 }
 0x100   :  { %v1204_v24 = vpack.c.bf16 %v1404_v22, %v1403_v18  ;;  %v1284_v25 = vpack.c.bf16 %v1436_v23, %v1435_v19  ;;  %v450_v26 = vpop.f32.mrb[19].mxu0  ;;  %v578_v27 = vpop.f32.mrb[19].mxu1 }
 0x101   :  { %v1199_v28 = vpack.c.bf16 %v450_v26, %v447_v20  ;;  %v1279_v29 = vpack.c.bf16 %v578_v27, %v575_v21 }
 0x102   :  { %1324 = vst [vmem:[%s1734_s2 + $0x48] sm:$0xff] %v1204_v24   ;;  %1340 = vst [vmem:[%s1734_s2 + $0xc8] sm:$0xff] %v1284_v25  }
 0x103   :  { %1323 = vst [vmem:[%s1734_s2 + $0x40] sm:$0xff] %v1199_v28   ;;  %1339 = vst [vmem:[%s1734_s2 + $0xc0] sm:$0xff] %v1279_v29  }
 0x105   :  { %v1407_v30 = vpop.f32.mrb[20].mxu0  ;;  %v1439_v31 = vpop.f32.mrb[20].mxu1 }
 0x106   :  { %v463_v32 = vpop.f32.mrb[21].mxu0  ;;  %v591_v33 = vpop.f32.mrb[21].mxu1 }
 0x107   :  { %v1408_v34 = vpop.f32.mrb[22].mxu0  ;;  %v1440_v35 = vpop.f32.mrb[22].mxu1 }
 0x108   :  { %v1214_v36 = vpack.c.bf16 %v1408_v34, %v1407_v30  ;;  %v1294_v37 = vpack.c.bf16 %v1440_v35, %v1439_v31  ;;  %v466_v38 = vpop.f32.mrb[23].mxu0  ;;  %v594_v39 = vpop.f32.mrb[23].mxu1 }
 0x109   :  { %v1209_v40 = vpack.c.bf16 %v466_v38, %v463_v32  ;;  %v1289_v41 = vpack.c.bf16 %v594_v39, %v591_v33 }
 0x10a   :  { %1326 = vst [vmem:[%s1734_s2 + $0x58] sm:$0xff] %v1214_v36   ;;  %1342 = vst [vmem:[%s1734_s2 + $0xd8] sm:$0xff] %v1294_v37  }
 0x10b   :  { %1325 = vst [vmem:[%s1734_s2 + $0x50] sm:$0xff] %v1209_v40   ;;  %1341 = vst [vmem:[%s1734_s2 + $0xd0] sm:$0xff] %v1289_v41  }
 0x10d   :  { %v1411_v42 = vpop.f32.mrb[24].mxu0  ;;  %v1443_v43 = vpop.f32.mrb[24].mxu1 }
 0x10e   :  { %v479_v44 = vpop.f32.mrb[25].mxu0  ;;  %v607_v45 = vpop.f32.mrb[25].mxu1 }
 0x10f   :  { %v1412_v46 = vpop.f32.mrb[26].mxu0  ;;  %v1444_v47 = vpop.f32.mrb[26].mxu1 }
 0x110   :  { %v1224_v48 = vpack.c.bf16 %v1412_v46, %v1411_v42  ;;  %v1304_v49 = vpack.c.bf16 %v1444_v47, %v1443_v43  ;;  %v482_v50 = vpop.f32.mrb[27].mxu0  ;;  %v610_v51 = vpop.f32.mrb[27].mxu1 }
 0x111   :  { %v1219_v52 = vpack.c.bf16 %v482_v50, %v479_v44  ;;  %v1299_v53 = vpack.c.bf16 %v610_v51, %v607_v45 }
 0x112   :  { %1328 = vst [vmem:[%s1734_s2 + $0x68] sm:$0xff] %v1224_v48   ;;  %1344 = vst [vmem:[%s1734_s2 + $0xe8] sm:$0xff] %v1304_v49  }
 0x113   :  { %1327 = vst [vmem:[%s1734_s2 + $0x60] sm:$0xff] %v1219_v52   ;;  %1343 = vst [vmem:[%s1734_s2 + $0xe0] sm:$0xff] %v1299_v53  }
 0x115   :  { %v1415_v54 = vpop.f32.mrb[28].mxu0  ;;  %v1447_v55 = vpop.f32.mrb[28].mxu1 }
 0x116   :  { %v495_v56 = vpop.f32.mrb[29].mxu0  ;;  %v623_v57 = vpop.f32.mrb[29].mxu1 }
 0x117   :  { %v1416_v58 = vpop.f32.mrb[30].mxu0  ;;  %v1448_v59 = vpop.f32.mrb[30].mxu1 }
 0x118   :  { %v1234_v60 = vpack.c.bf16 %v1416_v58, %v1415_v54  ;;  %v1314_v61 = vpack.c.bf16 %v1448_v59, %v1447_v55  ;;  %v498_v62 = vpop.f32.mrb[31].mxu0  ;;  %v626_v63 = vpop.f32.mrb[31].mxu1 }
 0x119   :  { %v1229_v0 = vpack.c.bf16 %v498_v62, %v495_v56  ;;  %v1309_v1 = vpack.c.bf16 %v626_v63, %v623_v57 }
 0x11a   :  { %1330 = vst [vmem:[%s1734_s2 + $0x78] sm:$0xff] %v1234_v60   ;;  %1346 = vst [vmem:[%s1734_s2 + $0xf8] sm:$0xff] %v1314_v61  }
 0x11b   :  { %1329 = vst [vmem:[%s1734_s2 + $0x70] sm:$0xff] %v1229_v0   ;;  %1345 = vst [vmem:[%s1734_s2 + $0xf0] sm:$0xff] %v1309_v1  }

// kernel: attribute_decoder_forward.6
= control target key start
LH: loop header
LB: loop body
LE: loop exit
PB: predicated region body
PF: predicated region fallthrough
CT: control target
= control target key end

     0   :  { %s1711_s1 = inlined_call_operand.vmem [shape: bf16[128,128], index: 1, kind: input, shape index: {}]   ;;  %s1712_s0 = inlined_call_operand.vmem [shape: bf16[512,128], index: 0, kind: input, shape index: {}]   ;;  %s1713_s2 = inlined_call_operand.vmem [shape: bf16[512,128], index: 2, kind: output, shape index: {}]  }
   0x1   :  { %v1440_v0 = vld [vmem:[%s1711_s1] sm:$0xff]   ;;  %v1441_v1 = vld [vmem:[%s1711_s1 + $0x8] sm:$0xff]   ;;  %v1442_v2 = vld [vmem:[%s1711_s1 + $0x10] sm:$0xff]  }
   0x2   :  { %1344 = vmatprep.subr.bf16.mxu0 %v1440_v0  ;;  %1424 = vmatprep.subr.bf16.mxu1 %v1440_v0  ;;  %v1443_v3 = vld [vmem:[%s1711_s1 + $0x18] sm:$0xff]   ;;  %v1448_v4 = vld [vmem:[%s1712_s0] sm:$0xff]   ;;  %v1445_v7 = vld [vmem:[%s1711_s1 + $0x28] sm:$0xff]  }
   0x3   :  { %1345 = vmatpush3.bf16.msra.mxu0 %v1440_v0  ;;  %1432 = vmatpush3.bf16.msra.mxu1 %v1440_v0  ;;  %v1449_v5 = vld [vmem:[%s1712_s0 + $0x80] sm:$0xff]   ;;  %v1446_v8 = vld [vmem:[%s1711_s1 + $0x30] sm:$0xff]   ;;  %v1447_v9 = vld [vmem:[%s1711_s1 + $0x38] sm:$0xff]  }
   0x4   :  { %1346 = vmatprep.subr.bf16.mxu0 %v1441_v1  ;;  %1425 = vmatprep.subr.bf16.mxu1 %v1441_v1  ;;  %v1444_v6 = vld [vmem:[%s1711_s1 + $0x20] sm:$0xff]   ;;  %v1450_v10 = vld [vmem:[%s1712_s0 + $0x8] sm:$0xff]   ;;  %v1452_v12 = vld [vmem:[%s1712_s0 + $0x10] sm:$0xff]  }
   0x5   :  { %1360 = vmatprep.mubr.bf16.mxu0 %v1448_v4  ;;  %1392 = vmatprep.mubr.bf16.mxu1 %v1449_v5  ;;  %v1451_v11 = vld [vmem:[%s1712_s0 + $0x88] sm:$0xff]   ;;  %v1453_v13 = vld [vmem:[%s1712_s0 + $0x90] sm:$0xff]   ;;  %v1454_v14 = vld [vmem:[%s1712_s0 + $0x18] sm:$0xff]  }
   0x6   :  { %v1455_v15 = vld [vmem:[%s1712_s0 + $0x98] sm:$0xff]   ;;  %v1456_v16 = vld [vmem:[%s1712_s0 + $0x20] sm:$0xff]   ;;  %v1458_v18 = vld [vmem:[%s1712_s0 + $0x28] sm:$0xff]  }
   0x7   :  { %1347 = vmatpush3.bf16.msra.mxu0 %v1441_v1  ;;  %1433 = vmatpush3.bf16.msra.mxu1 %v1441_v1  ;;  %v1457_v17 = vld [vmem:[%s1712_s0 + $0xa0] sm:$0xff]   ;;  %v1459_v19 = vld [vmem:[%s1712_s0 + $0xa8] sm:$0xff]   ;;  %v1460_v20 = vld [vmem:[%s1712_s0 + $0x30] sm:$0xff]  }
   0x8   :  { %1348 = vmatprep.subr.bf16.mxu0 %v1442_v2  ;;  %1426 = vmatprep.subr.bf16.mxu1 %v1442_v2  ;;  %v1461_v21 = vld [vmem:[%s1712_s0 + $0xb0] sm:$0xff]   ;;  %v1462_v22 = vld [vmem:[%s1712_s0 + $0x38] sm:$0xff]   ;;  %v1464_v24 = vld [vmem:[%s1712_s0 + $0x40] sm:$0xff]  }
   0x9   :  { %v1463_v23 = vld [vmem:[%s1712_s0 + $0xb8] sm:$0xff]   ;;  %v1465_v25 = vld [vmem:[%s1712_s0 + $0xc0] sm:$0xff]   ;;  %v1466_v26 = vld [vmem:[%s1712_s0 + $0x48] sm:$0xff]  }
   0xa   :  { %v1467_v27 = vld [vmem:[%s1712_s0 + $0xc8] sm:$0xff]   ;;  %v1468_v28 = vld [vmem:[%s1712_s0 + $0x50] sm:$0xff]   ;;  %v1470_v30 = vld [vmem:[%s1712_s0 + $0x58] sm:$0xff]  }
   0xb   :  { %1349 = vmatpush3.bf16.msra.mxu0 %v1442_v2  ;;  %1434 = vmatpush3.bf16.msra.mxu1 %v1442_v2  ;;  %v1469_v29 = vld [vmem:[%s1712_s0 + $0xd0] sm:$0xff]   ;;  %v1471_v31 = vld [vmem:[%s1712_s0 + $0xd8] sm:$0xff]   ;;  %v1472_v32 = vld [vmem:[%s1712_s0 + $0x60] sm:$0xff]  }
   0xc   :  { %1350 = vmatprep.subr.bf16.mxu0 %v1443_v3  ;;  %1427 = vmatprep.subr.bf16.mxu1 %v1443_v3  ;;  %v1473_v33 = vld [vmem:[%s1712_s0 + $0xe0] sm:$0xff]   ;;  %v1474_v34 = vld [vmem:[%s1712_s0 + $0x68] sm:$0xff]   ;;  %v1476_v36 = vld [vmem:[%s1712_s0 + $0x70] sm:$0xff]  }
   0xd   :  { %v1475_v35 = vld [vmem:[%s1712_s0 + $0xe8] sm:$0xff]   ;;  %v1477_v37 = vld [vmem:[%s1712_s0 + $0xf0] sm:$0xff]   ;;  %v1478_v38 = vld [vmem:[%s1712_s0 + $0x78] sm:$0xff]  }
   0xe   :  { %v1479_v39 = vld [vmem:[%s1712_s0 + $0xf8] sm:$0xff]  }
   0xf   :  { %1351 = vmatpush3.bf16.msra.mxu0 %v1443_v3  ;;  %1435 = vmatpush3.bf16.msra.mxu1 %v1443_v3 }
  0x10   :  { %1352 = vmatprep.subr.bf16.mxu0 %v1444_v6  ;;  %1428 = vmatprep.subr.bf16.mxu1 %v1444_v6 }
  0x13   :  { %1353 = vmatpush3.bf16.msra.mxu0 %v1444_v6  ;;  %1436 = vmatpush3.bf16.msra.mxu1 %v1444_v6 }
  0x14   :  { %1354 = vmatprep.subr.bf16.mxu0 %v1445_v7  ;;  %1429 = vmatprep.subr.bf16.mxu1 %v1445_v7 }
  0x17   :  { %1355 = vmatpush3.bf16.msra.mxu0 %v1445_v7  ;;  %1437 = vmatpush3.bf16.msra.mxu1 %v1445_v7 }
  0x18   :  { %1356 = vmatprep.subr.bf16.mxu0 %v1446_v8  ;;  %1430 = vmatprep.subr.bf16.mxu1 %v1446_v8 }
  0x1b   :  { %1357 = vmatpush3.bf16.msra.mxu0 %v1446_v8  ;;  %1438 = vmatpush3.bf16.msra.mxu1 %v1446_v8 }
  0x1c   :  { %1358 = vmatprep.subr.bf16.mxu0 %v1447_v9  ;;  %1431 = vmatprep.subr.bf16.mxu1 %v1447_v9 }
  0x1f   :  { %1359 = vmatpush3.bf16.msra.mxu0 %v1447_v9  ;;  %1439 = vmatpush3.bf16.msra.mxu1 %v1447_v9 }
  0x22   :  { %1361 = vmatmul.mubr.bf16.vlgmr.msra.gmra.mrb[0].mxu0 %v1450_v10  ;;  %1393 = vmatmul.mubr.bf16.vlgmr.msra.gmra.mrb[0].mxu1 %v1451_v11 }
  0x23   :  { %1364 = vmatprep.mubr.bf16.mxu0 %v1452_v12  ;;  %1396 = vmatprep.mubr.bf16.mxu1 %v1453_v13 }
  0x2a   :  { %1365 = vmatmul.mubr.bf16.gmra.mrb[4].mxu0 %v1454_v14  ;;  %1397 = vmatmul.mubr.bf16.gmra.mrb[4].mxu1 %v1455_v15 }
  0x2b   :  { %1368 = vmatprep.mubr.bf16.mxu0 %v1456_v16  ;;  %1400 = vmatprep.mubr.bf16.mxu1 %v1457_v17 }
  0x32   :  { %1369 = vmatmul.mubr.bf16.gmra.mrb[8].mxu0 %v1458_v18  ;;  %1401 = vmatmul.mubr.bf16.gmra.mrb[8].mxu1 %v1459_v19 }
  0x33   :  { %1372 = vmatprep.mubr.bf16.mxu0 %v1460_v20  ;;  %1404 = vmatprep.mubr.bf16.mxu1 %v1461_v21 }
  0x3a   :  { %1373 = vmatmul.mubr.bf16.gmra.mrb[12].mxu0 %v1462_v22  ;;  %1405 = vmatmul.mubr.bf16.gmra.mrb[12].mxu1 %v1463_v23 }
  0x3b   :  { %1376 = vmatprep.mubr.bf16.mxu0 %v1464_v24  ;;  %1408 = vmatprep.mubr.bf16.mxu1 %v1465_v25 }
  0x42   :  { %1377 = vmatmul.mubr.bf16.gmra.mrb[16].mxu0 %v1466_v26  ;;  %1409 = vmatmul.mubr.bf16.gmra.mrb[16].mxu1 %v1467_v27 }
  0x43   :  { %1380 = vmatprep.mubr.bf16.mxu0 %v1468_v28  ;;  %1412 = vmatprep.mubr.bf16.mxu1 %v1469_v29 }
  0x4a   :  { %1381 = vmatmul.mubr.bf16.gmra.mrb[20].mxu0 %v1470_v30  ;;  %1413 = vmatmul.mubr.bf16.gmra.mrb[20].mxu1 %v1471_v31 }
  0x4b   :  { %1384 = vmatprep.mubr.bf16.mxu0 %v1472_v32  ;;  %1416 = vmatprep.mubr.bf16.mxu1 %v1473_v33 }
  0x52   :  { %1385 = vmatmul.mubr.bf16.gmra.mrb[24].mxu0 %v1474_v34  ;;  %1417 = vmatmul.mubr.bf16.gmra.mrb[24].mxu1 %v1475_v35 }
  0x53   :  { %1388 = vmatprep.mubr.bf16.mxu0 %v1476_v36  ;;  %1420 = vmatprep.mubr.bf16.mxu1 %v1477_v37 }
  0x5a   :  { %1389 = vmatmul.mubr.bf16.gmra.mrb[28].mxu0 %v1478_v38  ;;  %1421 = vmatmul.mubr.bf16.gmra.mrb[28].mxu1 %v1479_v39 }
  0xf5   :  { %v1362_v40 = vpop.f32.mrb[0].mxu0  ;;  %v1394_v41 = vpop.f32.mrb[0].mxu1 }
  0xf6   :  { %v366_v42 = vpop.f32.mrb[1].mxu0  ;;  %v494_v43 = vpop.f32.mrb[1].mxu1 }
  0xf7   :  { %v1363_v44 = vpop.f32.mrb[2].mxu0  ;;  %v1395_v45 = vpop.f32.mrb[2].mxu1 }
  0xf8   :  { %v1121_v46 = vpack.c.bf16 %v1363_v44, %v1362_v40  ;;  %v1201_v47 = vpack.c.bf16 %v1395_v45, %v1394_v41  ;;  %v369_v48 = vpop.f32.mrb[3].mxu0  ;;  %v497_v49 = vpop.f32.mrb[3].mxu1 }
  0xf9   :  { %v1116_v50 = vpack.c.bf16 %v369_v48, %v366_v42  ;;  %v1196_v51 = vpack.c.bf16 %v497_v49, %v494_v43 }
  0xfa   :  { %1273 = vst [vmem:[%s1713_s2 + $0x8] sm:$0xff] %v1121_v46   ;;  %1289 = vst [vmem:[%s1713_s2 + $0x88] sm:$0xff] %v1201_v47  }
  0xfb   :  { %1117 = vst [vmem:[%s1713_s2] sm:$0xff] %v1116_v50   ;;  %1288 = vst [vmem:[%s1713_s2 + $0x80] sm:$0xff] %v1196_v51  }
  0xfd   :  { %v1366_v52 = vpop.f32.mrb[4].mxu0  ;;  %v1398_v53 = vpop.f32.mrb[4].mxu1 }
  0xfe   :  { %v382_v54 = vpop.f32.mrb[5].mxu0  ;;  %v510_v55 = vpop.f32.mrb[5].mxu1 }
  0xff   :  { %v1367_v56 = vpop.f32.mrb[6].mxu0  ;;  %v1399_v57 = vpop.f32.mrb[6].mxu1 }
 0x100   :  { %v1131_v58 = vpack.c.bf16 %v1367_v56, %v1366_v52  ;;  %v1211_v59 = vpack.c.bf16 %v1399_v57, %v1398_v53  ;;  %v385_v60 = vpop.f32.mrb[7].mxu0  ;;  %v513_v61 = vpop.f32.mrb[7].mxu1 }
 0x101   :  { %v1126_v62 = vpack.c.bf16 %v385_v60, %v382_v54  ;;  %v1206_v63 = vpack.c.bf16 %v513_v61, %v510_v55 }
 0x102   :  { %1275 = vst [vmem:[%s1713_s2 + $0x18] sm:$0xff] %v1131_v58   ;;  %1291 = vst [vmem:[%s1713_s2 + $0x98] sm:$0xff] %v1211_v59  }
 0x103   :  { %1274 = vst [vmem:[%s1713_s2 + $0x10] sm:$0xff] %v1126_v62   ;;  %1290 = vst [vmem:[%s1713_s2 + $0x90] sm:$0xff] %v1206_v63  }
 0x105   :  { %v1370_v0 = vpop.f32.mrb[8].mxu0  ;;  %v1402_v1 = vpop.f32.mrb[8].mxu1 }
 0x106   :  { %v398_v2 = vpop.f32.mrb[9].mxu0  ;;  %v526_v3 = vpop.f32.mrb[9].mxu1 }
 0x107   :  { %v1371_v4 = vpop.f32.mrb[10].mxu0  ;;  %v1403_v5 = vpop.f32.mrb[10].mxu1 }
 0x108   :  { %v1141_v6 = vpack.c.bf16 %v1371_v4, %v1370_v0  ;;  %v1221_v7 = vpack.c.bf16 %v1403_v5, %v1402_v1  ;;  %v401_v8 = vpop.f32.mrb[11].mxu0  ;;  %v529_v9 = vpop.f32.mrb[11].mxu1 }
 0x109   :  { %v1136_v10 = vpack.c.bf16 %v401_v8, %v398_v2  ;;  %v1216_v11 = vpack.c.bf16 %v529_v9, %v526_v3 }
 0x10a   :  { %1277 = vst [vmem:[%s1713_s2 + $0x28] sm:$0xff] %v1141_v6   ;;  %1293 = vst [vmem:[%s1713_s2 + $0xa8] sm:$0xff] %v1221_v7  }
 0x10b   :  { %1276 = vst [vmem:[%s1713_s2 + $0x20] sm:$0xff] %v1136_v10   ;;  %1292 = vst [vmem:[%s1713_s2 + $0xa0] sm:$0xff] %v1216_v11  }
 0x10d   :  { %v1374_v12 = vpop.f32.mrb[12].mxu0  ;;  %v1406_v13 = vpop.f32.mrb[12].mxu1 }
 0x10e   :  { %v414_v14 = vpop.f32.mrb[13].mxu0  ;;  %v542_v15 = vpop.f32.mrb[13].mxu1 }
 0x10f   :  { %v1375_v16 = vpop.f32.mrb[14].mxu0  ;;  %v1407_v17 = vpop.f32.mrb[14].mxu1 }
 0x110   :  { %v1151_v18 = vpack.c.bf16 %v1375_v16, %v1374_v12  ;;  %v1231_v19 = vpack.c.bf16 %v1407_v17, %v1406_v13  ;;  %v417_v20 = vpop.f32.mrb[15].mxu0  ;;  %v545_v21 = vpop.f32.mrb[15].mxu1 }
 0x111   :  { %v1146_v22 = vpack.c.bf16 %v417_v20, %v414_v14  ;;  %v1226_v23 = vpack.c.bf16 %v545_v21, %v542_v15 }
 0x112   :  { %1279 = vst [vmem:[%s1713_s2 + $0x38] sm:$0xff] %v1151_v18   ;;  %1295 = vst [vmem:[%s1713_s2 + $0xb8] sm:$0xff] %v1231_v19  }
 0x113   :  { %1278 = vst [vmem:[%s1713_s2 + $0x30] sm:$0xff] %v1146_v22   ;;  %1294 = vst [vmem:[%s1713_s2 + $0xb0] sm:$0xff] %v1226_v23  }
 0x115   :  { %v1378_v24 = vpop.f32.mrb[16].mxu0  ;;  %v1410_v25 = vpop.f32.mrb[16].mxu1 }
 0x116   :  { %v430_v26 = vpop.f32.mrb[17].mxu0  ;;  %v558_v27 = vpop.f32.mrb[17].mxu1 }
 0x117   :  { %v1379_v28 = vpop.f32.mrb[18].mxu0  ;;  %v1411_v29 = vpop.f32.mrb[18].mxu1 }
 0x118   :  { %v1161_v30 = vpack.c.bf16 %v1379_v28, %v1378_v24  ;;  %v1241_v31 = vpack.c.bf16 %v1411_v29, %v1410_v25  ;;  %v433_v32 = vpop.f32.mrb[19].mxu0  ;;  %v561_v33 = vpop.f32.mrb[19].mxu1 }
 0x119   :  { %v1156_v34 = vpack.c.bf16 %v433_v32, %v430_v26  ;;  %v1236_v35 = vpack.c.bf16 %v561_v33, %v558_v27 }
 0x11a   :  { %1281 = vst [vmem:[%s1713_s2 + $0x48] sm:$0xff] %v1161_v30   ;;  %1297 = vst [vmem:[%s1713_s2 + $0xc8] sm:$0xff] %v1241_v31  }
 0x11b   :  { %1280 = vst [vmem:[%s1713_s2 + $0x40] sm:$0xff] %v1156_v34   ;;  %1296 = vst [vmem:[%s1713_s2 + $0xc0] sm:$0xff] %v1236_v35  }
 0x11d   :  { %v1382_v36 = vpop.f32.mrb[20].mxu0  ;;  %v1414_v37 = vpop.f32.mrb[20].mxu1 }
 0x11e   :  { %v446_v38 = vpop.f32.mrb[21].mxu0  ;;  %v574_v39 = vpop.f32.mrb[21].mxu1 }
 0x11f   :  { %v1383_v40 = vpop.f32.mrb[22].mxu0  ;;  %v1415_v41 = vpop.f32.mrb[22].mxu1 }
 0x120   :  { %v1171_v42 = vpack.c.bf16 %v1383_v40, %v1382_v36  ;;  %v1251_v43 = vpack.c.bf16 %v1415_v41, %v1414_v37  ;;  %v449_v44 = vpop.f32.mrb[23].mxu0  ;;  %v577_v45 = vpop.f32.mrb[23].mxu1 }
 0x121   :  { %v1166_v46 = vpack.c.bf16 %v449_v44, %v446_v38  ;;  %v1246_v47 = vpack.c.bf16 %v577_v45, %v574_v39 }
 0x122   :  { %1283 = vst [vmem:[%s1713_s2 + $0x58] sm:$0xff] %v1171_v42   ;;  %1299 = vst [vmem:[%s1713_s2 + $0xd8] sm:$0xff] %v1251_v43  }
 0x123   :  { %1282 = vst [vmem:[%s1713_s2 + $0x50] sm:$0xff] %v1166_v46   ;;  %1298 = vst [vmem:[%s1713_s2 + $0xd0] sm:$0xff] %v1246_v47  }
 0x125   :  { %v1386_v48 = vpop.f32.mrb[24].mxu0  ;;  %v1418_v49 = vpop.f32.mrb[24].mxu1 }
 0x126   :  { %v462_v50 = vpop.f32.mrb[25].mxu0  ;;  %v590_v51 = vpop.f32.mrb[25].mxu1 }
 0x127   :  { %v1387_v52 = vpop.f32.mrb[26].mxu0  ;;  %v1419_v53 = vpop.f32.mrb[26].mxu1 }
 0x128   :  { %v1181_v54 = vpack.c.bf16 %v1387_v52, %v1386_v48  ;;  %v1261_v55 = vpack.c.bf16 %v1419_v53, %v1418_v49  ;;  %v465_v56 = vpop.f32.mrb[27].mxu0  ;;  %v593_v57 = vpop.f32.mrb[27].mxu1 }
 0x129   :  { %v1176_v58 = vpack.c.bf16 %v465_v56, %v462_v50  ;;  %v1256_v59 = vpack.c.bf16 %v593_v57, %v590_v51 }
 0x12a   :  { %1285 = vst [vmem:[%s1713_s2 + $0x68] sm:$0xff] %v1181_v54   ;;  %1301 = vst [vmem:[%s1713_s2 + $0xe8] sm:$0xff] %v1261_v55  }
 0x12b   :  { %1284 = vst [vmem:[%s1713_s2 + $0x60] sm:$0xff] %v1176_v58   ;;  %1300 = vst [vmem:[%s1713_s2 + $0xe0] sm:$0xff] %v1256_v59  }
 0x12d   :  { %v1390_v60 = vpop.f32.mrb[28].mxu0  ;;  %v1422_v61 = vpop.f32.mrb[28].mxu1 }
 0x12e   :  { %v478_v62 = vpop.f32.mrb[29].mxu0  ;;  %v606_v63 = vpop.f32.mrb[29].mxu1 }
 0x12f   :  { %v1391_v0 = vpop.f32.mrb[30].mxu0  ;;  %v1423_v1 = vpop.f32.mrb[30].mxu1 }
 0x130   :  { %v1191_v2 = vpack.c.bf16 %v1391_v0, %v1390_v60  ;;  %v1271_v3 = vpack.c.bf16 %v1423_v1, %v1422_v61  ;;  %v481_v4 = vpop.f32.mrb[31].mxu0  ;;  %v609_v5 = vpop.f32.mrb[31].mxu1 }
 0x131   :  { %v1186_v6 = vpack.c.bf16 %v481_v4, %v478_v62  ;;  %v1266_v7 = vpack.c.bf16 %v609_v5, %v606_v63 }
 0x132   :  { %1287 = vst [vmem:[%s1713_s2 + $0x78] sm:$0xff] %v1191_v2   ;;  %1303 = vst [vmem:[%s1713_s2 + $0xf8] sm:$0xff] %v1271_v3  }
 0x133   :  { %1286 = vst [vmem:[%s1713_s2 + $0x70] sm:$0xff] %v1186_v6   ;;  %1302 = vst [vmem:[%s1713_s2 + $0xf0] sm:$0xff] %v1266_v7  }

// kernel: attribute_decoder_forward.5
= control target key start
LH: loop header
LB: loop body
LE: loop exit
PB: predicated region body
PF: predicated region fallthrough
CT: control target
= control target key end

     0   :  { %s2364_s12 = smov 0   ;;  %s2366_s13 = smov 0   ;;  %s2621_s0 = inlined_call_operand.vmem [shape: bf16[512,128], index: 0, kind: input, shape index: {}]   ;;  %s2622_s1 = inlined_call_operand.vmem [shape: f32[1,128], index: 1, kind: input, shape index: {}]   ;;  %s2623_s2 = inlined_call_operand.vmem [shape: bf16[512,512], index: 2, kind: input, shape index: {}]   ;;  %s2624_s3 = inlined_call_operand.vmem [shape: bf16[512,128], index: 3, kind: output, shape index: {}]  }
   0x1   :  { %s2368_s14 = smov 0  }
   0x2 LB: > { %s25_s15 = sadd.s32 1, %s2338_s13  ;;  %p1679_p0 = scmp.ge.s32.totalorder %s2342_s14, 1  ;;  %s2342_s14 = sphi %s2368_s14, %s13_s14   ;;  %s2338_s13 = sphi %s2366_s13, %s2626_s13   ;;  %s2334_s12 = sphi %s2364_s12, %s2625_s12  }
   0x3   : > { %p27_p1 = scmp.ge.s32.totalorder %s25_s15, 2  ;;  %p169_p2 = scmp.lt.s32.totalorder %s2342_s14, 3 }
   0x5   : > { %s2628_s15 = smov (%p27_p1, %s25_s15), 0  ;;  %p170_p3 = pnand %p1679_p0, %p169_p2 }
   0x6   : > { %v2192_v0 = vld [vmem:[%s2621_s0 + $0x40] sm:$0xff] (!%p170_p3)   ;;  %v2196_v4 = vld [vmem:[%s2621_s0 + $0x48] sm:$0xff] (!%p170_p3)   ;;  %v2200_v8 = vld [vmem:[%s2621_s0 + $0x50] sm:$0xff] (!%p170_p3)   ;;  %s1680_s25 = sshll.u32 (!%p170_p3), %s2334_s12, 5 }
   0x7   : > { %173 = sbr.rel (%p170_p3) target bundleno = 387 (0x183), region = 32  ;;  %v2193_v1 = vld [vmem:[%s2621_s0 + $0xc0] sm:$0xff] (!%p170_p3)   ;;  %1944 = vmatprep.subr.bf16.mxu0 (!%p170_p3), %v2192_v0  ;;  %v2197_v5 = vld [vmem:[%s2621_s0 + $0xc8] sm:$0xff] (!%p170_p3)   ;;  %v2201_v9 = vld [vmem:[%s2621_s0 + $0xd0] sm:$0xff] (!%p170_p3)   ;;  %p211_p4 = scmp.lt.s32.totalorder (!%p170_p3), %s1680_s25, 63 }
   0x8   : > { %v2194_v2 = vld [vmem:[%s2621_s0] sm:$0xff] (!%p170_p3)   ;;  %2056 = vmatprep.subr.bf16.mxu1 (!%p170_p3), %v2193_v1  ;;  %v2198_v6 = vld [vmem:[%s2621_s0 + $0x8] sm:$0xff] (!%p170_p3)   ;;  %v2202_v10 = vld [vmem:[%s2621_s0 + $0x10] sm:$0xff] (!%p170_p3)  }
   0x9   : > { %v2195_v3 = vld [vmem:[%s2621_s0 + $0x80] sm:$0xff] (!%p170_p3)   ;;  %1945 = vmatpush3.bf16.msra.mxu0 (!%p170_p3), %v2194_v2  ;;  %v2199_v7 = vld [vmem:[%s2621_s0 + $0x88] sm:$0xff] (!%p170_p3)   ;;  %v2203_v11 = vld [vmem:[%s2621_s0 + $0x90] sm:$0xff] (!%p170_p3)  }
   0xa   : > { %2057 = vmatpush3.bf16.msra.mxu1 (!%p170_p3), %v2195_v3  ;;  %1946 = vmatprep.subr.bf16.mxu0 (!%p170_p3), %v2196_v4  ;;  %v2204_v12 = vld [vmem:[%s2621_s0 + $0x58] sm:$0xff] (!%p170_p3)   ;;  %v2208_v16 = vld [vmem:[%s2621_s0 + $0x60] sm:$0xff] (!%p170_p3)   ;;  %v2212_v20 = vld [vmem:[%s2621_s0 + $0x68] sm:$0xff] (!%p170_p3)  }
   0xb   : > { %2058 = vmatprep.subr.bf16.mxu1 (!%p170_p3), %v2197_v5  ;;  %v2205_v13 = vld [vmem:[%s2621_s0 + $0xd8] sm:$0xff] (!%p170_p3)   ;;  %v2209_v17 = vld [vmem:[%s2621_s0 + $0xe0] sm:$0xff] (!%p170_p3)   ;;  %v2213_v21 = vld [vmem:[%s2621_s0 + $0xe8] sm:$0xff] (!%p170_p3)  }
   0xc   : > { %v2206_v14 = vld [vmem:[%s2621_s0 + $0x18] sm:$0xff] (!%p170_p3)   ;;  %v2210_v18 = vld [vmem:[%s2621_s0 + $0x20] sm:$0xff] (!%p170_p3)   ;;  %v2214_v22 = vld [vmem:[%s2621_s0 + $0x28] sm:$0xff] (!%p170_p3)  }
   0xd   : > { %1947 = vmatpush3.bf16.msra.mxu0 (!%p170_p3), %v2198_v6  ;;  %v2207_v15 = vld [vmem:[%s2621_s0 + $0x98] sm:$0xff] (!%p170_p3)   ;;  %v2211_v19 = vld [vmem:[%s2621_s0 + $0xa0] sm:$0xff] (!%p170_p3)   ;;  %v2215_v23 = vld [vmem:[%s2621_s0 + $0xa8] sm:$0xff] (!%p170_p3)  }
   0xe   : > { %2059 = vmatpush3.bf16.msra.mxu1 %v2199_v7  ;;  %1948 = vmatprep.subr.bf16.mxu0 %v2200_v8  ;;  %s2630_s25 = smov (!%p211_p4, %s1680_s25), 63  ;;  %v2216_v24 = vld [vmem:[%s2621_s0 + $0x70] sm:$0xff]   ;;  %v2220_v28 = vld [vmem:[%s2621_s0 + $0x78] sm:$0xff]  }
   0xf   : > { %2060 = vmatprep.subr.bf16.mxu1 %v2201_v9  ;;  %v2217_v25 = vld [vmem:[%s2621_s0 + $0xf0] sm:$0xff]   ;;  %s1816_s24 = sshll.u32 %s2630_s25, 4  ;;  %v2221_v29 = vld [vmem:[%s2621_s0 + $0xf8] sm:$0xff]   ;;  %s1684_s17 = sshll.u32 %s2630_s25, 2 }
  0x10   : > { %v2218_v26 = vld [vmem:[%s2621_s0 + $0x30] sm:$0xff]   ;;  %s2481_s12 = scalar_lea.vmem %s2623_s2, %s1816_s24  ;;  %v2222_v30 = vld [vmem:[%s2621_s0 + $0x38] sm:$0xff]   ;;  %s2564_s20 = scalar_lea.vmem %s2624_s3, %s1684_s17 }
  0x11   : > { %1949 = vmatpush3.bf16.msra.mxu0 %v2202_v10  ;;  %v2219_v27 = vld [vmem:[%s2621_s0 + $0xb0] sm:$0xff]   ;;  %v2223_v31 = vld [vmem:[%s2621_s0 + $0xb8] sm:$0xff]  }
  0x12   : > { %2061 = vmatpush3.bf16.msra.mxu1 %v2203_v11  ;;  %1950 = vmatprep.subr.bf16.mxu0 %v2204_v12  ;;  %v2224_v32 = vld [vmem:[%s2481_s12] ss:$16 sps:$4 sm:$0xff]   ;;  %v2226_v33 = vld [vmem:[%s2481_s12 + $0x4] ss:$16 sps:$4 sm:$0xff]   ;;  %v2227_v34 = vld [vmem:[%s2481_s12 + $0x8] ss:$16 sps:$4 sm:$0xff]  }
  0x13   : > { %2062 = vmatprep.subr.bf16.mxu1 %v2205_v13  ;;  %v2229_v35 = vld [vmem:[%s2481_s12 + $0xc] ss:$16 sps:$4 sm:$0xff]   ;;  %968 = vmatprep.mubr.bf16.mxu0 %v2226_v33  ;;  %v2230_v36 = vld [vmem:[%s2481_s12 + $0x24] ss:$16 sps:$4 sm:$0xff]   ;;  %v2234_v38 = vld [vmem:[%s2481_s12 + $0x20] ss:$16 sps:$4 sm:$0xff]  }
  0x14   : > { %1129 = vmatprep.mubr.bf16.mxu1 %v2229_v35  ;;  %v2232_v37 = vld [vmem:[%s2481_s12 + $0x2c] ss:$16 sps:$4 sm:$0xff]   ;;  %v2235_v39 = vld [vmem:[%s2481_s12 + $0x28] ss:$16 sps:$4 sm:$0xff]   ;;  %v2236_v40 = vld [vmem:[%s2481_s12 + $0x44] ss:$16 sps:$4 sm:$0xff]  }
  0x15   : > { %1951 = vmatpush3.bf16.msra.mxu0 %v2206_v14  ;;  %v2238_v41 = vld [vmem:[%s2481_s12 + $0x4c] ss:$16 sps:$4 sm:$0xff]   ;;  %v2240_v42 = vld [vmem:[%s2481_s12 + $0x40] ss:$16 sps:$4 sm:$0xff]   ;;  %v2241_v43 = vld [vmem:[%s2481_s12 + $0x48] ss:$16 sps:$4 sm:$0xff]  }
  0x16   : > { %2063 = vmatpush3.bf16.msra.mxu1 %v2207_v15  ;;  %1952 = vmatprep.subr.bf16.mxu0 %v2208_v16  ;;  %v2242_v44 = vld [vmem:[%s2481_s12 + $0x64] ss:$16 sps:$4 sm:$0xff]   ;;  %v2244_v45 = vld [vmem:[%s2481_s12 + $0x6c] ss:$16 sps:$4 sm:$0xff]   ;;  %v2246_v46 = vld [vmem:[%s2481_s12 + $0x60] ss:$16 sps:$4 sm:$0xff]  }
  0x17   : > { %2064 = vmatprep.subr.bf16.mxu1 %v2209_v17  ;;  %v2247_v47 = vld [vmem:[%s2481_s12 + $0x68] ss:$16 sps:$4 sm:$0xff]   ;;  %v2248_v48 = vld [vmem:[%s2481_s12 + $0x84] ss:$16 sps:$4 sm:$0xff]   ;;  %v2250_v49 = vld [vmem:[%s2481_s12 + $0x8c] ss:$16 sps:$4 sm:$0xff]  }
  0x18   : > { %v2252_v50 = vld [vmem:[%s2481_s12 + $0x80] ss:$16 sps:$4 sm:$0xff]   ;;  %v2253_v51 = vld [vmem:[%s2481_s12 + $0x88] ss:$16 sps:$4 sm:$0xff]   ;;  %v2254_v52 = vld [vmem:[%s2481_s12 + $0xa4] ss:$16 sps:$4 sm:$0xff]  }
  0x19   : > { %1953 = vmatpush3.bf16.msra.mxu0 %v2210_v18  ;;  %v2256_v53 = vld [vmem:[%s2481_s12 + $0xac] ss:$16 sps:$4 sm:$0xff]   ;;  %v2258_v54 = vld [vmem:[%s2481_s12 + $0xa0] ss:$16 sps:$4 sm:$0xff]   ;;  %v2259_v55 = vld [vmem:[%s2481_s12 + $0xa8] ss:$16 sps:$4 sm:$0xff]  }
  0x1a   : > { %2065 = vmatpush3.bf16.msra.mxu1 %v2211_v19  ;;  %1954 = vmatprep.subr.bf16.mxu0 %v2212_v20  ;;  %v2260_v56 = vld [vmem:[%s2481_s12 + $0xc4] ss:$16 sps:$4 sm:$0xff]   ;;  %v2262_v57 = vld [vmem:[%s2481_s12 + $0xcc] ss:$16 sps:$4 sm:$0xff]   ;;  %v2264_v58 = vld [vmem:[%s2481_s12 + $0xc0] ss:$16 sps:$4 sm:$0xff]  }
  0x1b   : > { %2066 = vmatprep.subr.bf16.mxu1 %v2213_v21  ;;  %v2265_v59 = vld [vmem:[%s2481_s12 + $0xc8] ss:$16 sps:$4 sm:$0xff]   ;;  %v2266_v60 = vld [vmem:[%s2481_s12 + $0xe4] ss:$16 sps:$4 sm:$0xff]   ;;  %v2268_v61 = vld [vmem:[%s2481_s12 + $0xec] ss:$16 sps:$4 sm:$0xff]  }
  0x1c   : > { %v2270_v62 = vld [vmem:[%s2481_s12 + $0xe0] ss:$16 sps:$4 sm:$0xff]   ;;  %v2271_v63 = vld [vmem:[%s2481_s12 + $0xe8] ss:$16 sps:$4 sm:$0xff]   ;;  %v2272_v0 = vld [vmem:[%s2481_s12 + $0x104] ss:$16 sps:$4 sm:$0xff]  }
  0x1d   : > { %1955 = vmatpush3.bf16.msra.mxu0 %v2214_v22  ;;  %v2274_v1 = vld [vmem:[%s2481_s12 + $0x10c] ss:$16 sps:$4 sm:$0xff]   ;;  %v2276_v2 = vld [vmem:[%s2481_s12 + $0x100] ss:$16 sps:$4 sm:$0xff]   ;;  %v2277_v3 = vld [vmem:[%s2481_s12 + $0x108] ss:$16 sps:$4 sm:$0xff]  }
  0x1e   : > { %2067 = vmatpush3.bf16.msra.mxu1 %v2215_v23  ;;  %1956 = vmatprep.subr.bf16.mxu0 %v2216_v24  ;;  %v2278_v4 = vld [vmem:[%s2481_s12 + $0x124] ss:$16 sps:$4 sm:$0xff]   ;;  %v2280_v5 = vld [vmem:[%s2481_s12 + $0x12c] ss:$16 sps:$4 sm:$0xff]   ;;  %v2282_v6 = vld [vmem:[%s2481_s12 + $0x120] ss:$16 sps:$4 sm:$0xff]  }
  0x1f   : > { %2068 = vmatprep.subr.bf16.mxu1 %v2217_v25  ;;  %v2283_v7 = vld [vmem:[%s2481_s12 + $0x128] ss:$16 sps:$4 sm:$0xff]   ;;  %v2284_v8 = vld [vmem:[%s2481_s12 + $0x144] ss:$16 sps:$4 sm:$0xff]   ;;  %v2286_v9 = vld [vmem:[%s2481_s12 + $0x14c] ss:$16 sps:$4 sm:$0xff]  }
  0x20   : > { %v2288_v10 = vld [vmem:[%s2481_s12 + $0x140] ss:$16 sps:$4 sm:$0xff]   ;;  %v2289_v11 = vld [vmem:[%s2481_s12 + $0x148] ss:$16 sps:$4 sm:$0xff]   ;;  %v2290_v12 = vld [vmem:[%s2481_s12 + $0x164] ss:$16 sps:$4 sm:$0xff]  }
  0x21   : > { %1957 = vmatpush3.bf16.msra.mxu0 %v2218_v26  ;;  %v2292_v13 = vld [vmem:[%s2481_s12 + $0x16c] ss:$16 sps:$4 sm:$0xff]   ;;  %v2294_v14 = vld [vmem:[%s2481_s12 + $0x160] ss:$16 sps:$4 sm:$0xff]   ;;  %v2295_v15 = vld [vmem:[%s2481_s12 + $0x168] ss:$16 sps:$4 sm:$0xff]  }
  0x22   : > { %2069 = vmatpush3.bf16.msra.mxu1 %v2219_v27  ;;  %1958 = vmatprep.subr.bf16.mxu0 %v2220_v28  ;;  %v2296_v16 = vld [vmem:[%s2481_s12 + $0x184] ss:$16 sps:$4 sm:$0xff]   ;;  %v2298_v17 = vld [vmem:[%s2481_s12 + $0x18c] ss:$16 sps:$4 sm:$0xff]   ;;  %v2300_v18 = vld [vmem:[%s2481_s12 + $0x180] ss:$16 sps:$4 sm:$0xff]  }
  0x23   : > { %2070 = vmatprep.subr.bf16.mxu1 %v2221_v29  ;;  %v2301_v19 = vld [vmem:[%s2481_s12 + $0x188] ss:$16 sps:$4 sm:$0xff]   ;;  %v2302_v20 = vld [vmem:[%s2481_s12 + $0x1a4] ss:$16 sps:$4 sm:$0xff]   ;;  %v2304_v21 = vld [vmem:[%s2481_s12 + $0x1ac] ss:$16 sps:$4 sm:$0xff]  }
  0x24   : > { %v2306_v22 = vld [vmem:[%s2481_s12 + $0x1a0] ss:$16 sps:$4 sm:$0xff]   ;;  %v2307_v23 = vld [vmem:[%s2481_s12 + $0x1a8] ss:$16 sps:$4 sm:$0xff]   ;;  %v2308_v24 = vld [vmem:[%s2481_s12 + $0x1c4] ss:$16 sps:$4 sm:$0xff]  }
  0x25   : > { %1959 = vmatpush3.bf16.msra.mxu0 %v2222_v30  ;;  %v2310_v25 = vld [vmem:[%s2481_s12 + $0x1cc] ss:$16 sps:$4 sm:$0xff]   ;;  %v2312_v26 = vld [vmem:[%s2481_s12 + $0x1c0] ss:$16 sps:$4 sm:$0xff]   ;;  %v2313_v27 = vld [vmem:[%s2481_s12 + $0x1c8] ss:$16 sps:$4 sm:$0xff]  }
  0x26   : > { %2071 = vmatpush3.bf16.msra.mxu1 %v2223_v31  ;;  %v2314_v28 = vld [vmem:[%s2481_s12 + $0x1e4] ss:$16 sps:$4 sm:$0xff]   ;;  %v2316_v29 = vld [vmem:[%s2481_s12 + $0x1ec] ss:$16 sps:$4 sm:$0xff]   ;;  %v2318_v30 = vld [vmem:[%s2481_s12 + $0x1e0] ss:$16 sps:$4 sm:$0xff]  }
  0x27   : > { %v2319_v31 = vld [vmem:[%s2481_s12 + $0x1e8] ss:$16 sps:$4 sm:$0xff]  }
  0x28   : > { %969 = vmatmul.mubr.bf16.vlgmr.msra.gmra.mrb[0].mxu0 %v2224_v32 }
  0x29   : > { %1130 = vmatmul.mubr.bf16.vlgmr.msra.gmra.mrb[0].mxu1 %v2227_v34  ;;  %976 = vmatprep.mubr.bf16.mxu0 %v2230_v36 }
  0x2a   : > { %1137 = vmatprep.mubr.bf16.mxu1 %v2232_v37 }
  0x30   : > { %977 = vmatmul.mubr.bf16.gmra.mrb[4].mxu0 %v2234_v38 }
  0x31   : > { %1138 = vmatmul.mubr.bf16.gmra.mrb[4].mxu1 %v2235_v39  ;;  %984 = vmatprep.mubr.bf16.mxu0 %v2236_v40 }
  0x32   : > { %1145 = vmatprep.mubr.bf16.mxu1 %v2238_v41  ;;  %v2556_v41 = vld [vmem:[%s2622_s1] ss:$0 sm:$0xff] }
  0x38   : > { %985 = vmatmul.mubr.bf16.gmra.mrb[8].mxu0 %v2240_v42 }
  0x39   : > { %1146 = vmatmul.mubr.bf16.gmra.mrb[8].mxu1 %v2241_v43  ;;  %992 = vmatprep.mubr.bf16.mxu0 %v2242_v44 }
  0x3a   : > { %1153 = vmatprep.mubr.bf16.mxu1 %v2244_v45 }
  0x40   : > { %993 = vmatmul.mubr.bf16.gmra.mrb[12].mxu0 %v2246_v46 }
  0x41   : > { %1154 = vmatmul.mubr.bf16.gmra.mrb[12].mxu1 %v2247_v47  ;;  %1000 = vmatprep.mubr.bf16.mxu0 %v2248_v48 }
  0x42   : > { %1161 = vmatprep.mubr.bf16.mxu1 %v2250_v49 }
  0x48   : > { %1001 = vmatmul.mubr.bf16.gmra.mrb[16].mxu0 %v2252_v50 }
  0x49   : > { %1162 = vmatmul.mubr.bf16.gmra.mrb[16].mxu1 %v2253_v51  ;;  %1008 = vmatprep.mubr.bf16.mxu0 %v2254_v52 }
  0x4a   : > { %1169 = vmatprep.mubr.bf16.mxu1 %v2256_v53 }
  0x50   : > { %1009 = vmatmul.mubr.bf16.gmra.mrb[20].mxu0 %v2258_v54 }
  0x51   : > { %1170 = vmatmul.mubr.bf16.gmra.mrb[20].mxu1 %v2259_v55  ;;  %1016 = vmatprep.mubr.bf16.mxu0 %v2260_v56 }
  0x52   : > { %1177 = vmatprep.mubr.bf16.mxu1 %v2262_v57 }
  0x58   : > { %1017 = vmatmul.mubr.bf16.gmra.mrb[24].mxu0 %v2264_v58 }
  0x59   : > { %1178 = vmatmul.mubr.bf16.gmra.mrb[24].mxu1 %v2265_v59  ;;  %1024 = vmatprep.mubr.bf16.mxu0 %v2266_v60 }
  0x5a   : > { %1185 = vmatprep.mubr.bf16.mxu1 %v2268_v61 }
  0x60   : > { %1025 = vmatmul.mubr.bf16.gmra.mrb[28].mxu0 %v2270_v62 }
  0x61   : > { %1186 = vmatmul.mubr.bf16.gmra.mrb[28].mxu1 %v2271_v63  ;;  %1032 = vmatprep.mubr.bf16.mxu0 %v2272_v0 }
  0x62   : > { %1193 = vmatprep.mubr.bf16.mxu1 %v2274_v1 }
  0x68   : > { %1033 = vmatmul.mubr.bf16.gmra.mrb[32].mxu0 %v2276_v2 }
  0x69   : > { %1194 = vmatmul.mubr.bf16.gmra.mrb[32].mxu1 %v2277_v3  ;;  %1040 = vmatprep.mubr.bf16.mxu0 %v2278_v4 }
  0x6a   : > { %1201 = vmatprep.mubr.bf16.mxu1 %v2280_v5 }
  0x70   : > { %1041 = vmatmul.mubr.bf16.gmra.mrb[36].mxu0 %v2282_v6 }
  0x71   : > { %1202 = vmatmul.mubr.bf16.gmra.mrb[36].mxu1 %v2283_v7  ;;  %1048 = vmatprep.mubr.bf16.mxu0 %v2284_v8 }
  0x72   : > { %1209 = vmatprep.mubr.bf16.mxu1 %v2286_v9 }
  0x78   : > { %1049 = vmatmul.mubr.bf16.gmra.mrb[40].mxu0 %v2288_v10 }
  0x79   : > { %1210 = vmatmul.mubr.bf16.gmra.mrb[40].mxu1 %v2289_v11  ;;  %1056 = vmatprep.mubr.bf16.mxu0 %v2290_v12 }
  0x7a   : > { %1217 = vmatprep.mubr.bf16.mxu1 %v2292_v13 }
  0x80   : > { %1057 = vmatmul.mubr.bf16.gmra.mrb[44].mxu0 %v2294_v14 }
  0x81   : > { %1218 = vmatmul.mubr.bf16.gmra.mrb[44].mxu1 %v2295_v15  ;;  %1064 = vmatprep.mubr.bf16.mxu0 %v2296_v16 }
  0x82   : > { %1225 = vmatprep.mubr.bf16.mxu1 %v2298_v17 }
  0x88   : > { %1065 = vmatmul.mubr.bf16.gmra.mrb[48].mxu0 %v2300_v18 }
  0x89   : > { %1226 = vmatmul.mubr.bf16.gmra.mrb[48].mxu1 %v2301_v19  ;;  %1072 = vmatprep.mubr.bf16.mxu0 %v2302_v20 }
  0x8a   : > { %1233 = vmatprep.mubr.bf16.mxu1 %v2304_v21 }
  0x90   : > { %1073 = vmatmul.mubr.bf16.gmra.mrb[52].mxu0 %v2306_v22 }
  0x91   : > { %1234 = vmatmul.mubr.bf16.gmra.mrb[52].mxu1 %v2307_v23  ;;  %1080 = vmatprep.mubr.bf16.mxu0 %v2308_v24 }
  0x92   : > { %1241 = vmatprep.mubr.bf16.mxu1 %v2310_v25 }
  0x98   : > { %1081 = vmatmul.mubr.bf16.gmra.mrb[56].mxu0 %v2312_v26 }
  0x99   : > { %1242 = vmatmul.mubr.bf16.gmra.mrb[56].mxu1 %v2313_v27  ;;  %1088 = vmatprep.mubr.bf16.mxu0 %v2314_v28 }
  0x9a   : > { %1249 = vmatprep.mubr.bf16.mxu1 %v2316_v29 }
  0xa0   : > { %1089 = vmatmul.mubr.bf16.gmra.mrb[60].mxu0 %v2318_v30 }
  0xa1   : > { %1250 = vmatmul.mubr.bf16.gmra.mrb[60].mxu1 %v2319_v31 }
  0xfb   : > { %v1960_v32 = vpop.f32.mrb[0].mxu0 }
  0xfc   : > { %v2072_v33 = vpop.f32.mrb[0].mxu1  ;;  %v1961_v34 = vpop.f32.mrb[1].mxu0 }
  0xfd   : > { %v1962_v35 = vadd.f32 %v1961_v34, %v1960_v32  ;;  %v2073_v36 = vpop.f32.mrb[1].mxu1  ;;  %v1963_v37 = vpop.f32.mrb[2].mxu0 }
  0xfe   : > { %v2074_v38 = vadd.f32 %v2073_v36, %v2072_v33  ;;  %v2075_v39 = vpop.f32.mrb[2].mxu1  ;;  %v1964_v40 = vpop.f32.mrb[3].mxu0 }
  0xff   : > { %v1965_v42 = vadd.f32 %v1964_v40, %v1963_v37  ;;  %v2076_v43 = vpop.f32.mrb[3].mxu1 }
 0x100   : > { %v1132_v44 = vadd.f32 %v2074_v38, %v1962_v35  ;;  %v2077_v45 = vadd.f32 %v2076_v43, %v2075_v39 }
 0x102   : > { %v1364_v46 = vadd.f32 %v2556_v41, %v1132_v44  ;;  %v1135_v47 = vadd.f32 %v2077_v45, %v1965_v42 }
 0x103   : > { %v1966_v48 = vpop.f32.mrb[4].mxu0 }
 0x104   : > { %v1365_v49 = vadd.f32 %v2556_v41, %v1135_v47  ;;  %v2078_v50 = vpop.f32.mrb[4].mxu1  ;;  %v1967_v51 = vpop.f32.mrb[5].mxu0  ;;  %v1396_v55 = vmax.f32 %v1364_v46, 0.0 }
 0x105   : > { %v1968_v52 = vadd.f32 %v1967_v51, %v1966_v48  ;;  %v2079_v53 = vpop.f32.mrb[5].mxu1  ;;  %v1969_v54 = vpop.f32.mrb[6].mxu0 }
 0x106   : > { %v1397_v56 = vmax.f32 %v1365_v49, 0.0  ;;  %v2080_v57 = vadd.f32 %v2079_v53, %v2078_v50  ;;  %v2081_v58 = vpop.f32.mrb[6].mxu1  ;;  %v1970_v59 = vpop.f32.mrb[7].mxu0 }
 0x107   : > { %v1971_v60 = vadd.f32 %v1970_v59, %v1969_v54  ;;  %v2082_v61 = vpop.f32.mrb[7].mxu1 }
 0x108   : > { %v1852_v62 = vpack.c.bf16 %v1397_v56, %v1396_v55  ;;  %v1140_v63 = vadd.f32 %v2080_v57, %v1968_v52  ;;  %v2083_v0 = vadd.f32 %v2082_v61, %v2081_v58 }
 0x10a   : > { %1853 = vst [vmem:[%s2564_s20] sm:$0xff] %v1852_v62   ;;  %v1366_v1 = vadd.f32 %v2556_v41, %v1140_v63  ;;  %v1143_v2 = vadd.f32 %v2083_v0, %v1971_v60 }
 0x10b   : > { %v1972_v3 = vpop.f32.mrb[8].mxu0 }
 0x10c   : > { %v1367_v4 = vadd.f32 %v2556_v41, %v1143_v2  ;;  %v2084_v5 = vpop.f32.mrb[8].mxu1  ;;  %v1973_v6 = vpop.f32.mrb[9].mxu0  ;;  %v1398_v10 = vmax.f32 %v1366_v1, 0.0 }
 0x10d   : > { %v1974_v7 = vadd.f32 %v1973_v6, %v1972_v3  ;;  %v2085_v8 = vpop.f32.mrb[9].mxu1  ;;  %v1975_v9 = vpop.f32.mrb[10].mxu0 }
 0x10e   : > { %v1399_v11 = vmax.f32 %v1367_v4, 0.0  ;;  %v2086_v12 = vadd.f32 %v2085_v8, %v2084_v5  ;;  %v2087_v13 = vpop.f32.mrb[10].mxu1  ;;  %v1976_v14 = vpop.f32.mrb[11].mxu0 }
 0x10f   : > { %v1977_v15 = vadd.f32 %v1976_v14, %v1975_v9  ;;  %v2088_v16 = vpop.f32.mrb[11].mxu1 }
 0x110   : > { %v1857_v17 = vpack.c.bf16 %v1399_v11, %v1398_v10  ;;  %v1148_v18 = vadd.f32 %v2086_v12, %v1974_v7  ;;  %v2089_v19 = vadd.f32 %v2088_v16, %v2087_v13 }
 0x112   : > { %1929 = vst [vmem:[%s2564_s20 + $0x8] sm:$0xff] %v1857_v17   ;;  %v1368_v20 = vadd.f32 %v2556_v41, %v1148_v18  ;;  %v1151_v21 = vadd.f32 %v2089_v19, %v1977_v15 }
 0x113   : > { %v1978_v22 = vpop.f32.mrb[12].mxu0 }
 0x114   : > { %v1369_v23 = vadd.f32 %v2556_v41, %v1151_v21  ;;  %v2090_v24 = vpop.f32.mrb[12].mxu1  ;;  %v1979_v25 = vpop.f32.mrb[13].mxu0  ;;  %v1400_v29 = vmax.f32 %v1368_v20, 0.0 }
 0x115   : > { %v1980_v26 = vadd.f32 %v1979_v25, %v1978_v22  ;;  %v2091_v27 = vpop.f32.mrb[13].mxu1  ;;  %v1981_v28 = vpop.f32.mrb[14].mxu0 }
 0x116   : > { %v1401_v30 = vmax.f32 %v1369_v23, 0.0  ;;  %v2092_v31 = vadd.f32 %v2091_v27, %v2090_v24  ;;  %v2093_v32 = vpop.f32.mrb[14].mxu1  ;;  %v1982_v33 = vpop.f32.mrb[15].mxu0 }
 0x117   : > { %v1983_v34 = vadd.f32 %v1982_v33, %v1981_v28  ;;  %v2094_v35 = vpop.f32.mrb[15].mxu1 }
 0x118   : > { %v1862_v36 = vpack.c.bf16 %v1401_v30, %v1400_v29  ;;  %v1156_v37 = vadd.f32 %v2092_v31, %v1980_v26  ;;  %v2095_v38 = vadd.f32 %v2094_v35, %v2093_v32 }
 0x11a   : > { %1930 = vst [vmem:[%s2564_s20 + $0x10] sm:$0xff] %v1862_v36   ;;  %v1370_v39 = vadd.f32 %v2556_v41, %v1156_v37  ;;  %v1159_v40 = vadd.f32 %v2095_v38, %v1983_v34 }
 0x11b   : > { %v1984_v42 = vpop.f32.mrb[16].mxu0 }
 0x11c   : > { %v1371_v43 = vadd.f32 %v2556_v41, %v1159_v40  ;;  %v2096_v44 = vpop.f32.mrb[16].mxu1  ;;  %v1985_v45 = vpop.f32.mrb[17].mxu0  ;;  %v1402_v49 = vmax.f32 %v1370_v39, 0.0 }
 0x11d   : > { %v1986_v46 = vadd.f32 %v1985_v45, %v1984_v42  ;;  %v2097_v47 = vpop.f32.mrb[17].mxu1  ;;  %v1987_v48 = vpop.f32.mrb[18].mxu0 }
 0x11e   : > { %v1403_v50 = vmax.f32 %v1371_v43, 0.0  ;;  %v2098_v51 = vadd.f32 %v2097_v47, %v2096_v44  ;;  %v2099_v52 = vpop.f32.mrb[18].mxu1  ;;  %v1988_v53 = vpop.f32.mrb[19].mxu0 }
 0x11f   : > { %v1989_v54 = vadd.f32 %v1988_v53, %v1987_v48  ;;  %v2100_v55 = vpop.f32.mrb[19].mxu1 }
 0x120   : > { %v1867_v56 = vpack.c.bf16 %v1403_v50, %v1402_v49  ;;  %v1164_v57 = vadd.f32 %v2098_v51, %v1986_v46  ;;  %v2101_v58 = vadd.f32 %v2100_v55, %v2099_v52 }
 0x122   : > { %1931 = vst [vmem:[%s2564_s20 + $0x18] sm:$0xff] %v1867_v56   ;;  %v1372_v59 = vadd.f32 %v2556_v41, %v1164_v57  ;;  %v1167_v60 = vadd.f32 %v2101_v58, %v1989_v54 }
 0x123   : > { %v1990_v61 = vpop.f32.mrb[20].mxu0 }
 0x124   : > { %v1373_v62 = vadd.f32 %v2556_v41, %v1167_v60  ;;  %v2102_v63 = vpop.f32.mrb[20].mxu1  ;;  %v1991_v0 = vpop.f32.mrb[21].mxu0  ;;  %v1404_v4 = vmax.f32 %v1372_v59, 0.0 }
 0x125   : > { %v1992_v1 = vadd.f32 %v1991_v0, %v1990_v61  ;;  %v2103_v2 = vpop.f32.mrb[21].mxu1  ;;  %v1993_v3 = vpop.f32.mrb[22].mxu0 }
 0x126   : > { %v1405_v5 = vmax.f32 %v1373_v62, 0.0  ;;  %v2104_v6 = vadd.f32 %v2103_v2, %v2102_v63  ;;  %v2105_v7 = vpop.f32.mrb[22].mxu1  ;;  %v1994_v8 = vpop.f32.mrb[23].mxu0 }
 0x127   : > { %v1995_v9 = vadd.f32 %v1994_v8, %v1993_v3  ;;  %v2106_v10 = vpop.f32.mrb[23].mxu1 }
 0x128   : > { %v1872_v11 = vpack.c.bf16 %v1405_v5, %v1404_v4  ;;  %v1172_v12 = vadd.f32 %v2104_v6, %v1992_v1  ;;  %v2107_v13 = vadd.f32 %v2106_v10, %v2105_v7 }
 0x12a   : > { %1932 = vst [vmem:[%s2564_s20 + $0x20] sm:$0xff] %v1872_v11   ;;  %v1374_v14 = vadd.f32 %v2556_v41, %v1172_v12  ;;  %v1175_v15 = vadd.f32 %v2107_v13, %v1995_v9 }
 0x12b   : > { %v1996_v16 = vpop.f32.mrb[24].mxu0 }
 0x12c   : > { %v1375_v17 = vadd.f32 %v2556_v41, %v1175_v15  ;;  %v2108_v18 = vpop.f32.mrb[24].mxu1  ;;  %v1997_v19 = vpop.f32.mrb[25].mxu0  ;;  %v1406_v23 = vmax.f32 %v1374_v14, 0.0 }
 0x12d   : > { %v1998_v20 = vadd.f32 %v1997_v19, %v1996_v16  ;;  %v2109_v21 = vpop.f32.mrb[25].mxu1  ;;  %v1999_v22 = vpop.f32.mrb[26].mxu0 }
 0x12e   : > { %v1407_v24 = vmax.f32 %v1375_v17, 0.0  ;;  %v2110_v25 = vadd.f32 %v2109_v21, %v2108_v18  ;;  %v2111_v26 = vpop.f32.mrb[26].mxu1  ;;  %v2000_v27 = vpop.f32.mrb[27].mxu0 }
 0x12f   : > { %v2001_v28 = vadd.f32 %v2000_v27, %v1999_v22  ;;  %v2112_v29 = vpop.f32.mrb[27].mxu1 }
 0x130   : > { %v1877_v30 = vpack.c.bf16 %v1407_v24, %v1406_v23  ;;  %v1180_v31 = vadd.f32 %v2110_v25, %v1998_v20  ;;  %v2113_v32 = vadd.f32 %v2112_v29, %v2111_v26 }
 0x132   : > { %1933 = vst [vmem:[%s2564_s20 + $0x28] sm:$0xff] %v1877_v30   ;;  %v1376_v33 = vadd.f32 %v2556_v41, %v1180_v31  ;;  %v1183_v34 = vadd.f32 %v2113_v32, %v2001_v28 }
 0x133   : > { %v2002_v35 = vpop.f32.mrb[28].mxu0 }
 0x134   : > { %v1377_v36 = vadd.f32 %v2556_v41, %v1183_v34  ;;  %v2114_v37 = vpop.f32.mrb[28].mxu1  ;;  %v2003_v38 = vpop.f32.mrb[29].mxu0  ;;  %v1408_v43 = vmax.f32 %v1376_v33, 0.0 }
 0x135   : > { %v2004_v39 = vadd.f32 %v2003_v38, %v2002_v35  ;;  %v2115_v40 = vpop.f32.mrb[29].mxu1  ;;  %v2005_v42 = vpop.f32.mrb[30].mxu0 }
 0x136   : > { %v1409_v44 = vmax.f32 %v1377_v36, 0.0  ;;  %v2116_v45 = vadd.f32 %v2115_v40, %v2114_v37  ;;  %v2117_v46 = vpop.f32.mrb[30].mxu1  ;;  %v2006_v47 = vpop.f32.mrb[31].mxu0 }
 0x137   : > { %v2007_v48 = vadd.f32 %v2006_v47, %v2005_v42  ;;  %v2118_v49 = vpop.f32.mrb[31].mxu1 }
 0x138   : > { %v1882_v50 = vpack.c.bf16 %v1409_v44, %v1408_v43  ;;  %v1188_v51 = vadd.f32 %v2116_v45, %v2004_v39  ;;  %v2119_v52 = vadd.f32 %v2118_v49, %v2117_v46 }
 0x13a   : > { %1934 = vst [vmem:[%s2564_s20 + $0x30] sm:$0xff] %v1882_v50   ;;  %v1378_v53 = vadd.f32 %v2556_v41, %v1188_v51  ;;  %v1191_v54 = vadd.f32 %v2119_v52, %v2007_v48 }
 0x13b   : > { %v2008_v55 = vpop.f32.mrb[32].mxu0 }
 0x13c   : > { %v1379_v56 = vadd.f32 %v2556_v41, %v1191_v54  ;;  %v2120_v57 = vpop.f32.mrb[32].mxu1  ;;  %v2009_v58 = vpop.f32.mrb[33].mxu0  ;;  %v1410_v62 = vmax.f32 %v1378_v53, 0.0 }
 0x13d   : > { %v2010_v59 = vadd.f32 %v2009_v58, %v2008_v55  ;;  %v2121_v60 = vpop.f32.mrb[33].mxu1  ;;  %v2011_v61 = vpop.f32.mrb[34].mxu0 }
 0x13e   : > { %v1411_v63 = vmax.f32 %v1379_v56, 0.0  ;;  %v2122_v0 = vadd.f32 %v2121_v60, %v2120_v57  ;;  %v2123_v1 = vpop.f32.mrb[34].mxu1  ;;  %v2012_v2 = vpop.f32.mrb[35].mxu0 }
 0x13f   : > { %v2013_v3 = vadd.f32 %v2012_v2, %v2011_v61  ;;  %v2124_v4 = vpop.f32.mrb[35].mxu1 }
 0x140   : > { %v1887_v5 = vpack.c.bf16 %v1411_v63, %v1410_v62  ;;  %v1196_v6 = vadd.f32 %v2122_v0, %v2010_v59  ;;  %v2125_v7 = vadd.f32 %v2124_v4, %v2123_v1 }
 0x142   : > { %1935 = vst [vmem:[%s2564_s20 + $0x38] sm:$0xff] %v1887_v5   ;;  %v1380_v8 = vadd.f32 %v2556_v41, %v1196_v6  ;;  %v1199_v9 = vadd.f32 %v2125_v7, %v2013_v3 }
 0x143   : > { %v2014_v10 = vpop.f32.mrb[36].mxu0 }
 0x144   : > { %v1381_v11 = vadd.f32 %v2556_v41, %v1199_v9  ;;  %v2126_v12 = vpop.f32.mrb[36].mxu1  ;;  %v2015_v13 = vpop.f32.mrb[37].mxu0  ;;  %v1412_v17 = vmax.f32 %v1380_v8, 0.0 }
 0x145   : > { %v2016_v14 = vadd.f32 %v2015_v13, %v2014_v10  ;;  %v2127_v15 = vpop.f32.mrb[37].mxu1  ;;  %v2017_v16 = vpop.f32.mrb[38].mxu0 }
 0x146   : > { %v1413_v18 = vmax.f32 %v1381_v11, 0.0  ;;  %v2128_v19 = vadd.f32 %v2127_v15, %v2126_v12  ;;  %v2129_v20 = vpop.f32.mrb[38].mxu1  ;;  %v2018_v21 = vpop.f32.mrb[39].mxu0 }
 0x147   : > { %v2019_v22 = vadd.f32 %v2018_v21, %v2017_v16  ;;  %v2130_v23 = vpop.f32.mrb[39].mxu1 }
 0x148   : > { %v1892_v24 = vpack.c.bf16 %v1413_v18, %v1412_v17  ;;  %v1204_v25 = vadd.f32 %v2128_v19, %v2016_v14  ;;  %v2131_v26 = vadd.f32 %v2130_v23, %v2129_v20 }
 0x14a   : > { %1936 = vst [vmem:[%s2564_s20 + $0x40] sm:$0xff] %v1892_v24   ;;  %v1382_v27 = vadd.f32 %v2556_v41, %v1204_v25  ;;  %v1207_v28 = vadd.f32 %v2131_v26, %v2019_v22 }
 0x14b   : > { %v2020_v29 = vpop.f32.mrb[40].mxu0 }
 0x14c   : > { %v1383_v30 = vadd.f32 %v2556_v41, %v1207_v28  ;;  %v2132_v31 = vpop.f32.mrb[40].mxu1  ;;  %v2021_v32 = vpop.f32.mrb[41].mxu0  ;;  %v1414_v36 = vmax.f32 %v1382_v27, 0.0 }
 0x14d   : > { %v2022_v33 = vadd.f32 %v2021_v32, %v2020_v29  ;;  %v2133_v34 = vpop.f32.mrb[41].mxu1  ;;  %v2023_v35 = vpop.f32.mrb[42].mxu0 }
 0x14e   : > { %v1415_v37 = vmax.f32 %v1383_v30, 0.0  ;;  %v2134_v38 = vadd.f32 %v2133_v34, %v2132_v31  ;;  %v2135_v39 = vpop.f32.mrb[42].mxu1  ;;  %v2024_v40 = vpop.f32.mrb[43].mxu0 }
 0x14f   : > { %v2025_v42 = vadd.f32 %v2024_v40, %v2023_v35  ;;  %v2136_v43 = vpop.f32.mrb[43].mxu1 }
 0x150   : > { %v1897_v44 = vpack.c.bf16 %v1415_v37, %v1414_v36  ;;  %v1212_v45 = vadd.f32 %v2134_v38, %v2022_v33  ;;  %v2137_v46 = vadd.f32 %v2136_v43, %v2135_v39 }
 0x152   : > { %1937 = vst [vmem:[%s2564_s20 + $0x48] sm:$0xff] %v1897_v44   ;;  %v1384_v47 = vadd.f32 %v2556_v41, %v1212_v45  ;;  %v1215_v48 = vadd.f32 %v2137_v46, %v2025_v42 }
 0x153   : > { %v2026_v49 = vpop.f32.mrb[44].mxu0 }
 0x154   : > { %v1385_v50 = vadd.f32 %v2556_v41, %v1215_v48  ;;  %v2138_v51 = vpop.f32.mrb[44].mxu1  ;;  %v2027_v52 = vpop.f32.mrb[45].mxu0  ;;  %v1416_v56 = vmax.f32 %v1384_v47, 0.0 }
 0x155   : > { %v2028_v53 = vadd.f32 %v2027_v52, %v2026_v49  ;;  %v2139_v54 = vpop.f32.mrb[45].mxu1  ;;  %v2029_v55 = vpop.f32.mrb[46].mxu0 }
 0x156   : > { %v1417_v57 = vmax.f32 %v1385_v50, 0.0  ;;  %v2140_v58 = vadd.f32 %v2139_v54, %v2138_v51  ;;  %v2141_v59 = vpop.f32.mrb[46].mxu1  ;;  %v2030_v60 = vpop.f32.mrb[47].mxu0 }
 0x157   : > { %v2031_v61 = vadd.f32 %v2030_v60, %v2029_v55  ;;  %v2142_v62 = vpop.f32.mrb[47].mxu1 }
 0x158   : > { %v1902_v63 = vpack.c.bf16 %v1417_v57, %v1416_v56  ;;  %v1220_v0 = vadd.f32 %v2140_v58, %v2028_v53  ;;  %v2143_v1 = vadd.f32 %v2142_v62, %v2141_v59 }
 0x15a   : > { %1938 = vst [vmem:[%s2564_s20 + $0x50] sm:$0xff] %v1902_v63   ;;  %v1386_v2 = vadd.f32 %v2556_v41, %v1220_v0  ;;  %v1223_v3 = vadd.f32 %v2143_v1, %v2031_v61 }
 0x15b   : > { %v2032_v4 = vpop.f32.mrb[48].mxu0 }
 0x15c   : > { %v1387_v5 = vadd.f32 %v2556_v41, %v1223_v3  ;;  %v2144_v6 = vpop.f32.mrb[48].mxu1  ;;  %v2033_v7 = vpop.f32.mrb[49].mxu0  ;;  %v1418_v11 = vmax.f32 %v1386_v2, 0.0 }
 0x15d   : > { %v2034_v8 = vadd.f32 %v2033_v7, %v2032_v4  ;;  %v2145_v9 = vpop.f32.mrb[49].mxu1  ;;  %v2035_v10 = vpop.f32.mrb[50].mxu0 }
 0x15e   : > { %v1419_v12 = vmax.f32 %v1387_v5, 0.0  ;;  %v2146_v13 = vadd.f32 %v2145_v9, %v2144_v6  ;;  %v2147_v14 = vpop.f32.mrb[50].mxu1  ;;  %v2036_v15 = vpop.f32.mrb[51].mxu0 }
 0x15f   : > { %v2037_v16 = vadd.f32 %v2036_v15, %v2035_v10  ;;  %v2148_v17 = vpop.f32.mrb[51].mxu1 }
 0x160   : > { %v1907_v18 = vpack.c.bf16 %v1419_v12, %v1418_v11  ;;  %v1228_v19 = vadd.f32 %v2146_v13, %v2034_v8  ;;  %v2149_v20 = vadd.f32 %v2148_v17, %v2147_v14 }
 0x162   : > { %1939 = vst [vmem:[%s2564_s20 + $0x58] sm:$0xff] %v1907_v18   ;;  %v1388_v21 = vadd.f32 %v2556_v41, %v1228_v19  ;;  %v1231_v22 = vadd.f32 %v2149_v20, %v2037_v16 }
 0x163   : > { %v2038_v23 = vpop.f32.mrb[52].mxu0 }
 0x164   : > { %v1389_v24 = vadd.f32 %v2556_v41, %v1231_v22  ;;  %v2150_v25 = vpop.f32.mrb[52].mxu1  ;;  %v2039_v26 = vpop.f32.mrb[53].mxu0  ;;  %v1420_v30 = vmax.f32 %v1388_v21, 0.0 }
 0x165   : > { %v2040_v27 = vadd.f32 %v2039_v26, %v2038_v23  ;;  %v2151_v28 = vpop.f32.mrb[53].mxu1  ;;  %v2041_v29 = vpop.f32.mrb[54].mxu0 }
 0x166   : > { %v1421_v31 = vmax.f32 %v1389_v24, 0.0  ;;  %v2152_v32 = vadd.f32 %v2151_v28, %v2150_v25  ;;  %v2153_v33 = vpop.f32.mrb[54].mxu1  ;;  %v2042_v34 = vpop.f32.mrb[55].mxu0 }
 0x167   : > { %v2043_v35 = vadd.f32 %v2042_v34, %v2041_v29  ;;  %v2154_v36 = vpop.f32.mrb[55].mxu1 }
 0x168   : > { %v1912_v37 = vpack.c.bf16 %v1421_v31, %v1420_v30  ;;  %v1236_v38 = vadd.f32 %v2152_v32, %v2040_v27  ;;  %v2155_v39 = vadd.f32 %v2154_v36, %v2153_v33 }
 0x16a   : > { %1940 = vst [vmem:[%s2564_s20 + $0x60] sm:$0xff] %v1912_v37   ;;  %v1390_v40 = vadd.f32 %v2556_v41, %v1236_v38  ;;  %v1239_v42 = vadd.f32 %v2155_v39, %v2043_v35 }
 0x16b   : > { %v2044_v43 = vpop.f32.mrb[56].mxu0 }
 0x16c   : > { %v1391_v44 = vadd.f32 %v2556_v41, %v1239_v42  ;;  %v2156_v45 = vpop.f32.mrb[56].mxu1  ;;  %v2045_v46 = vpop.f32.mrb[57].mxu0  ;;  %v1422_v50 = vmax.f32 %v1390_v40, 0.0 }
 0x16d   : > { %v2046_v47 = vadd.f32 %v2045_v46, %v2044_v43  ;;  %v2157_v48 = vpop.f32.mrb[57].mxu1  ;;  %v2047_v49 = vpop.f32.mrb[58].mxu0 }
 0x16e   : > { %v1423_v51 = vmax.f32 %v1391_v44, 0.0  ;;  %v2158_v52 = vadd.f32 %v2157_v48, %v2156_v45  ;;  %v2159_v53 = vpop.f32.mrb[58].mxu1  ;;  %v2048_v54 = vpop.f32.mrb[59].mxu0 }
 0x16f   : > { %v2049_v55 = vadd.f32 %v2048_v54, %v2047_v49  ;;  %v2160_v56 = vpop.f32.mrb[59].mxu1 }
 0x170   : > { %v1917_v57 = vpack.c.bf16 %v1423_v51, %v1422_v50  ;;  %v1244_v58 = vadd.f32 %v2158_v52, %v2046_v47  ;;  %v2161_v59 = vadd.f32 %v2160_v56, %v2159_v53 }
 0x172   : > { %1941 = vst [vmem:[%s2564_s20 + $0x68] sm:$0xff] %v1917_v57   ;;  %v1392_v60 = vadd.f32 %v2556_v41, %v1244_v58  ;;  %v1247_v61 = vadd.f32 %v2161_v59, %v2049_v55 }
 0x173   : > { %v2050_v62 = vpop.f32.mrb[60].mxu0 }
 0x174   : > { %v1393_v63 = vadd.f32 %v2556_v41, %v1247_v61  ;;  %v2162_v0 = vpop.f32.mrb[60].mxu1  ;;  %v2051_v1 = vpop.f32.mrb[61].mxu0  ;;  %v1424_v5 = vmax.f32 %v1392_v60, 0.0 }
 0x175   : > { %v2052_v2 = vadd.f32 %v2051_v1, %v2050_v62  ;;  %v2163_v3 = vpop.f32.mrb[61].mxu1  ;;  %v2053_v4 = vpop.f32.mrb[62].mxu0 }
 0x176   : > { %v1425_v6 = vmax.f32 %v1393_v63, 0.0  ;;  %v2164_v7 = vadd.f32 %v2163_v3, %v2162_v0  ;;  %v2165_v8 = vpop.f32.mrb[62].mxu1  ;;  %v2054_v9 = vpop.f32.mrb[63].mxu0 }
 0x177   : > { %v2055_v10 = vadd.f32 %v2054_v9, %v2053_v4  ;;  %v2166_v11 = vpop.f32.mrb[63].mxu1 }
 0x178   : > { %v1922_v12 = vpack.c.bf16 %v1425_v6, %v1424_v5  ;;  %v1252_v13 = vadd.f32 %v2164_v7, %v2052_v2  ;;  %v2167_v14 = vadd.f32 %v2166_v11, %v2165_v8 }
 0x17a   : > { %1942 = vst [vmem:[%s2564_s20 + $0x70] sm:$0xff] %v1922_v12   ;;  %v1394_v15 = vadd.f32 %v2556_v41, %v1252_v13  ;;  %v1255_v16 = vadd.f32 %v2167_v14, %v2055_v10 }
 0x17c   : > { %v1395_v17 = vadd.f32 %v2556_v41, %v1255_v16  ;;  %v1426_v18 = vmax.f32 %v1394_v15, 0.0 }
 0x17e   : > { %v1427_v19 = vmax.f32 %v1395_v17, 0.0 }
 0x180   : > { %v1927_v20 = vpack.c.bf16 %v1427_v19, %v1426_v18 }
 0x182   : > { %1943 = vst [vmem:[%s2564_s20 + $0x78] sm:$0xff] %v1927_v20  }
 0x183 PF: > { %s13_s14 = sadd.s32 1, %s2342_s14   ;;  %s2625_s12 = smov %s2338_s13 }
 0x184   : > { %p10_p5 = scmp.ge.s32.totalorder %s13_s14, 4   ;;  %s2626_s13 = smov %s2628_s15 }
 0x186   :  { %12 = sbr.rel (!%p10_p5) target bundleno = 2 (0x2), region = 73 }

// kernel: attribute_decoder_forward.7
= control target key start
LH: loop header
LB: loop body
LE: loop exit
PB: predicated region body
PF: predicated region fallthrough
CT: control target
= control target key end

     0   :  { %s2077_s12 = smov 0   ;;  %s2079_s13 = smov 0   ;;  %s2350_s0 = inlined_call_operand.vmem [shape: bf16[512,128], index: 0, kind: input, shape index: {}]   ;;  %s2351_s1 = inlined_call_operand.vmem [shape: f32[1,128], index: 1, kind: input, shape index: {}]   ;;  %s2352_s2 = inlined_call_operand.vmem [shape: bf16[512,512], index: 2, kind: input, shape index: {}]   ;;  %s2353_s3 = inlined_call_operand.vmem [shape: f32[512,128], index: 3, kind: output, shape index: {}]  }
   0x1   :  { %s2081_s14 = smov 0  }
   0x2 LB: > { %s25_s15 = sadd.s32 1, %s2051_s13  ;;  %p1551_p0 = scmp.ge.s32.totalorder %s2055_s14, 1  ;;  %s2055_s14 = sphi %s2081_s14, %s13_s14   ;;  %s2051_s13 = sphi %s2079_s13, %s2355_s13   ;;  %s2047_s12 = sphi %s2077_s12, %s2354_s12  }
   0x3   : > { %p27_p1 = scmp.ge.s32.totalorder %s25_s15, 2  ;;  %p169_p2 = scmp.lt.s32.totalorder %s2055_s14, 3 }
   0x5   : > { %s2357_s15 = smov (%p27_p1, %s25_s15), 0  ;;  %p170_p3 = pnand %p1551_p0, %p169_p2 }
   0x6   : > { %v1905_v0 = vld [vmem:[%s2350_s0 + $0x40] sm:$0xff] (!%p170_p3)   ;;  %v1909_v4 = vld [vmem:[%s2350_s0 + $0x48] sm:$0xff] (!%p170_p3)   ;;  %v1913_v8 = vld [vmem:[%s2350_s0 + $0x50] sm:$0xff] (!%p170_p3)   ;;  %s1552_s25 = sshll.u32 (!%p170_p3), %s2047_s12, 5 }
   0x7   : > { %173 = sbr.rel (%p170_p3) target bundleno = 385 (0x181), region = 32  ;;  %v1906_v1 = vld [vmem:[%s2350_s0 + $0xc0] sm:$0xff] (!%p170_p3)   ;;  %1657 = vmatprep.subr.bf16.mxu0 (!%p170_p3), %v1905_v0  ;;  %v1910_v5 = vld [vmem:[%s2350_s0 + $0xc8] sm:$0xff] (!%p170_p3)   ;;  %v1914_v9 = vld [vmem:[%s2350_s0 + $0xd0] sm:$0xff] (!%p170_p3)   ;;  %p211_p4 = scmp.lt.s32.totalorder (!%p170_p3), %s1552_s25, 63 }
   0x8   : > { %v1907_v2 = vld [vmem:[%s2350_s0] sm:$0xff] (!%p170_p3)   ;;  %1769 = vmatprep.subr.bf16.mxu1 (!%p170_p3), %v1906_v1  ;;  %v1911_v6 = vld [vmem:[%s2350_s0 + $0x8] sm:$0xff] (!%p170_p3)   ;;  %v1915_v10 = vld [vmem:[%s2350_s0 + $0x10] sm:$0xff] (!%p170_p3)  }
   0x9   : > { %v1908_v3 = vld [vmem:[%s2350_s0 + $0x80] sm:$0xff] (!%p170_p3)   ;;  %1658 = vmatpush3.bf16.msra.mxu0 (!%p170_p3), %v1907_v2  ;;  %v1912_v7 = vld [vmem:[%s2350_s0 + $0x88] sm:$0xff] (!%p170_p3)   ;;  %v1916_v11 = vld [vmem:[%s2350_s0 + $0x90] sm:$0xff] (!%p170_p3)  }
   0xa   : > { %1770 = vmatpush3.bf16.msra.mxu1 (!%p170_p3), %v1908_v3  ;;  %1659 = vmatprep.subr.bf16.mxu0 (!%p170_p3), %v1909_v4  ;;  %v1917_v12 = vld [vmem:[%s2350_s0 + $0x58] sm:$0xff] (!%p170_p3)   ;;  %v1921_v16 = vld [vmem:[%s2350_s0 + $0x60] sm:$0xff] (!%p170_p3)   ;;  %v1925_v20 = vld [vmem:[%s2350_s0 + $0x68] sm:$0xff] (!%p170_p3)  }
   0xb   : > { %1771 = vmatprep.subr.bf16.mxu1 (!%p170_p3), %v1910_v5  ;;  %v1918_v13 = vld [vmem:[%s2350_s0 + $0xd8] sm:$0xff] (!%p170_p3)   ;;  %v1922_v17 = vld [vmem:[%s2350_s0 + $0xe0] sm:$0xff] (!%p170_p3)   ;;  %v1926_v21 = vld [vmem:[%s2350_s0 + $0xe8] sm:$0xff] (!%p170_p3)  }
   0xc   : > { %v1919_v14 = vld [vmem:[%s2350_s0 + $0x18] sm:$0xff] (!%p170_p3)   ;;  %v1923_v18 = vld [vmem:[%s2350_s0 + $0x20] sm:$0xff] (!%p170_p3)   ;;  %v1927_v22 = vld [vmem:[%s2350_s0 + $0x28] sm:$0xff] (!%p170_p3)  }
   0xd   : > { %1660 = vmatpush3.bf16.msra.mxu0 (!%p170_p3), %v1911_v6  ;;  %v1920_v15 = vld [vmem:[%s2350_s0 + $0x98] sm:$0xff] (!%p170_p3)   ;;  %v1924_v19 = vld [vmem:[%s2350_s0 + $0xa0] sm:$0xff] (!%p170_p3)   ;;  %v1928_v23 = vld [vmem:[%s2350_s0 + $0xa8] sm:$0xff] (!%p170_p3)  }
   0xe   : > { %1772 = vmatpush3.bf16.msra.mxu1 %v1912_v7  ;;  %1661 = vmatprep.subr.bf16.mxu0 %v1913_v8  ;;  %s2359_s25 = smov (!%p211_p4, %s1552_s25), 63  ;;  %v1929_v24 = vld [vmem:[%s2350_s0 + $0x70] sm:$0xff]   ;;  %v1933_v28 = vld [vmem:[%s2350_s0 + $0x78] sm:$0xff]  }
   0xf   : > { %1773 = vmatprep.subr.bf16.mxu1 %v1914_v9  ;;  %v1930_v25 = vld [vmem:[%s2350_s0 + $0xf0] sm:$0xff]   ;;  %s1656_s24 = sshll.u32 %s2359_s25, 4  ;;  %v1934_v29 = vld [vmem:[%s2350_s0 + $0xf8] sm:$0xff]   ;;  %s1556_s17 = sshll.u32 %s2359_s25, 3 }
  0x10   : > { %v1931_v26 = vld [vmem:[%s2350_s0 + $0x30] sm:$0xff]   ;;  %s2194_s12 = scalar_lea.vmem %s2352_s2, %s1656_s24  ;;  %v1935_v30 = vld [vmem:[%s2350_s0 + $0x38] sm:$0xff]   ;;  %s2276_s20 = scalar_lea.vmem %s2353_s3, %s1556_s17 }
  0x11   : > { %1662 = vmatpush3.bf16.msra.mxu0 %v1915_v10  ;;  %v1932_v27 = vld [vmem:[%s2350_s0 + $0xb0] sm:$0xff]   ;;  %v1936_v31 = vld [vmem:[%s2350_s0 + $0xb8] sm:$0xff]  }
  0x12   : > { %1774 = vmatpush3.bf16.msra.mxu1 %v1916_v11  ;;  %1663 = vmatprep.subr.bf16.mxu0 %v1917_v12  ;;  %v1937_v32 = vld [vmem:[%s2194_s12] ss:$16 sps:$4 sm:$0xff]   ;;  %v1939_v33 = vld [vmem:[%s2194_s12 + $0x4] ss:$16 sps:$4 sm:$0xff]   ;;  %v1940_v34 = vld [vmem:[%s2194_s12 + $0x8] ss:$16 sps:$4 sm:$0xff]  }
  0x13   : > { %1775 = vmatprep.subr.bf16.mxu1 %v1918_v13  ;;  %v1942_v35 = vld [vmem:[%s2194_s12 + $0xc] ss:$16 sps:$4 sm:$0xff]   ;;  %968 = vmatprep.mubr.bf16.mxu0 %v1939_v33  ;;  %v1943_v36 = vld [vmem:[%s2194_s12 + $0x24] ss:$16 sps:$4 sm:$0xff]   ;;  %v1947_v38 = vld [vmem:[%s2194_s12 + $0x20] ss:$16 sps:$4 sm:$0xff]  }
  0x14   : > { %1129 = vmatprep.mubr.bf16.mxu1 %v1942_v35  ;;  %v1945_v37 = vld [vmem:[%s2194_s12 + $0x2c] ss:$16 sps:$4 sm:$0xff]   ;;  %v1948_v39 = vld [vmem:[%s2194_s12 + $0x28] ss:$16 sps:$4 sm:$0xff]   ;;  %v1949_v40 = vld [vmem:[%s2194_s12 + $0x44] ss:$16 sps:$4 sm:$0xff]  }
  0x15   : > { %1664 = vmatpush3.bf16.msra.mxu0 %v1919_v14  ;;  %v1951_v41 = vld [vmem:[%s2194_s12 + $0x4c] ss:$16 sps:$4 sm:$0xff]   ;;  %v1953_v42 = vld [vmem:[%s2194_s12 + $0x40] ss:$16 sps:$4 sm:$0xff]   ;;  %v1954_v43 = vld [vmem:[%s2194_s12 + $0x48] ss:$16 sps:$4 sm:$0xff]  }
  0x16   : > { %1776 = vmatpush3.bf16.msra.mxu1 %v1920_v15  ;;  %1665 = vmatprep.subr.bf16.mxu0 %v1921_v16  ;;  %v1955_v44 = vld [vmem:[%s2194_s12 + $0x64] ss:$16 sps:$4 sm:$0xff]   ;;  %v1957_v45 = vld [vmem:[%s2194_s12 + $0x6c] ss:$16 sps:$4 sm:$0xff]   ;;  %v1959_v46 = vld [vmem:[%s2194_s12 + $0x60] ss:$16 sps:$4 sm:$0xff]  }
  0x17   : > { %1777 = vmatprep.subr.bf16.mxu1 %v1922_v17  ;;  %v1960_v47 = vld [vmem:[%s2194_s12 + $0x68] ss:$16 sps:$4 sm:$0xff]   ;;  %v1961_v48 = vld [vmem:[%s2194_s12 + $0x84] ss:$16 sps:$4 sm:$0xff]   ;;  %v1963_v49 = vld [vmem:[%s2194_s12 + $0x8c] ss:$16 sps:$4 sm:$0xff]  }
  0x18   : > { %v1965_v50 = vld [vmem:[%s2194_s12 + $0x80] ss:$16 sps:$4 sm:$0xff]   ;;  %v1966_v51 = vld [vmem:[%s2194_s12 + $0x88] ss:$16 sps:$4 sm:$0xff]   ;;  %v1967_v52 = vld [vmem:[%s2194_s12 + $0xa4] ss:$16 sps:$4 sm:$0xff]  }
  0x19   : > { %1666 = vmatpush3.bf16.msra.mxu0 %v1923_v18  ;;  %v1969_v53 = vld [vmem:[%s2194_s12 + $0xac] ss:$16 sps:$4 sm:$0xff]   ;;  %v1971_v54 = vld [vmem:[%s2194_s12 + $0xa0] ss:$16 sps:$4 sm:$0xff]   ;;  %v1972_v55 = vld [vmem:[%s2194_s12 + $0xa8] ss:$16 sps:$4 sm:$0xff]  }
  0x1a   : > { %1778 = vmatpush3.bf16.msra.mxu1 %v1924_v19  ;;  %1667 = vmatprep.subr.bf16.mxu0 %v1925_v20  ;;  %v1973_v56 = vld [vmem:[%s2194_s12 + $0xc4] ss:$16 sps:$4 sm:$0xff]   ;;  %v1975_v57 = vld [vmem:[%s2194_s12 + $0xcc] ss:$16 sps:$4 sm:$0xff]   ;;  %v1977_v58 = vld [vmem:[%s2194_s12 + $0xc0] ss:$16 sps:$4 sm:$0xff]  }
  0x1b   : > { %1779 = vmatprep.subr.bf16.mxu1 %v1926_v21  ;;  %v1978_v59 = vld [vmem:[%s2194_s12 + $0xc8] ss:$16 sps:$4 sm:$0xff]   ;;  %v1979_v60 = vld [vmem:[%s2194_s12 + $0xe4] ss:$16 sps:$4 sm:$0xff]   ;;  %v1981_v61 = vld [vmem:[%s2194_s12 + $0xec] ss:$16 sps:$4 sm:$0xff]  }
  0x1c   : > { %v1983_v62 = vld [vmem:[%s2194_s12 + $0xe0] ss:$16 sps:$4 sm:$0xff]   ;;  %v1984_v63 = vld [vmem:[%s2194_s12 + $0xe8] ss:$16 sps:$4 sm:$0xff]   ;;  %v1985_v0 = vld [vmem:[%s2194_s12 + $0x104] ss:$16 sps:$4 sm:$0xff]  }
  0x1d   : > { %1668 = vmatpush3.bf16.msra.mxu0 %v1927_v22  ;;  %v1987_v1 = vld [vmem:[%s2194_s12 + $0x10c] ss:$16 sps:$4 sm:$0xff]   ;;  %v1989_v2 = vld [vmem:[%s2194_s12 + $0x100] ss:$16 sps:$4 sm:$0xff]   ;;  %v1990_v3 = vld [vmem:[%s2194_s12 + $0x108] ss:$16 sps:$4 sm:$0xff]  }
  0x1e   : > { %1780 = vmatpush3.bf16.msra.mxu1 %v1928_v23  ;;  %1669 = vmatprep.subr.bf16.mxu0 %v1929_v24  ;;  %v1991_v4 = vld [vmem:[%s2194_s12 + $0x124] ss:$16 sps:$4 sm:$0xff]   ;;  %v1993_v5 = vld [vmem:[%s2194_s12 + $0x12c] ss:$16 sps:$4 sm:$0xff]   ;;  %v1995_v6 = vld [vmem:[%s2194_s12 + $0x120] ss:$16 sps:$4 sm:$0xff]  }
  0x1f   : > { %1781 = vmatprep.subr.bf16.mxu1 %v1930_v25  ;;  %v1996_v7 = vld [vmem:[%s2194_s12 + $0x128] ss:$16 sps:$4 sm:$0xff]   ;;  %v1997_v8 = vld [vmem:[%s2194_s12 + $0x144] ss:$16 sps:$4 sm:$0xff]   ;;  %v1999_v9 = vld [vmem:[%s2194_s12 + $0x14c] ss:$16 sps:$4 sm:$0xff]  }
  0x20   : > { %v2001_v10 = vld [vmem:[%s2194_s12 + $0x140] ss:$16 sps:$4 sm:$0xff]   ;;  %v2002_v11 = vld [vmem:[%s2194_s12 + $0x148] ss:$16 sps:$4 sm:$0xff]   ;;  %v2003_v12 = vld [vmem:[%s2194_s12 + $0x164] ss:$16 sps:$4 sm:$0xff]  }
  0x21   : > { %1670 = vmatpush3.bf16.msra.mxu0 %v1931_v26  ;;  %v2005_v13 = vld [vmem:[%s2194_s12 + $0x16c] ss:$16 sps:$4 sm:$0xff]   ;;  %v2007_v14 = vld [vmem:[%s2194_s12 + $0x160] ss:$16 sps:$4 sm:$0xff]   ;;  %v2008_v15 = vld [vmem:[%s2194_s12 + $0x168] ss:$16 sps:$4 sm:$0xff]  }
  0x22   : > { %1782 = vmatpush3.bf16.msra.mxu1 %v1932_v27  ;;  %1671 = vmatprep.subr.bf16.mxu0 %v1933_v28  ;;  %v2009_v16 = vld [vmem:[%s2194_s12 + $0x184] ss:$16 sps:$4 sm:$0xff]   ;;  %v2011_v17 = vld [vmem:[%s2194_s12 + $0x18c] ss:$16 sps:$4 sm:$0xff]   ;;  %v2013_v18 = vld [vmem:[%s2194_s12 + $0x180] ss:$16 sps:$4 sm:$0xff]  }
  0x23   : > { %1783 = vmatprep.subr.bf16.mxu1 %v1934_v29  ;;  %v2014_v19 = vld [vmem:[%s2194_s12 + $0x188] ss:$16 sps:$4 sm:$0xff]   ;;  %v2015_v20 = vld [vmem:[%s2194_s12 + $0x1a4] ss:$16 sps:$4 sm:$0xff]   ;;  %v2017_v21 = vld [vmem:[%s2194_s12 + $0x1ac] ss:$16 sps:$4 sm:$0xff]  }
  0x24   : > { %v2019_v22 = vld [vmem:[%s2194_s12 + $0x1a0] ss:$16 sps:$4 sm:$0xff]   ;;  %v2020_v23 = vld [vmem:[%s2194_s12 + $0x1a8] ss:$16 sps:$4 sm:$0xff]   ;;  %v2021_v24 = vld [vmem:[%s2194_s12 + $0x1c4] ss:$16 sps:$4 sm:$0xff]  }
  0x25   : > { %1672 = vmatpush3.bf16.msra.mxu0 %v1935_v30  ;;  %v2023_v25 = vld [vmem:[%s2194_s12 + $0x1cc] ss:$16 sps:$4 sm:$0xff]   ;;  %v2025_v26 = vld [vmem:[%s2194_s12 + $0x1c0] ss:$16 sps:$4 sm:$0xff]   ;;  %v2026_v27 = vld [vmem:[%s2194_s12 + $0x1c8] ss:$16 sps:$4 sm:$0xff]  }
  0x26   : > { %1784 = vmatpush3.bf16.msra.mxu1 %v1936_v31  ;;  %v2027_v28 = vld [vmem:[%s2194_s12 + $0x1e4] ss:$16 sps:$4 sm:$0xff]   ;;  %v2029_v29 = vld [vmem:[%s2194_s12 + $0x1ec] ss:$16 sps:$4 sm:$0xff]   ;;  %v2031_v30 = vld [vmem:[%s2194_s12 + $0x1e0] ss:$16 sps:$4 sm:$0xff]  }
  0x27   : > { %v2032_v31 = vld [vmem:[%s2194_s12 + $0x1e8] ss:$16 sps:$4 sm:$0xff]  }
  0x28   : > { %969 = vmatmul.mubr.bf16.vlgmr.msra.gmra.mrb[0].mxu0 %v1937_v32 }
  0x29   : > { %1130 = vmatmul.mubr.bf16.vlgmr.msra.gmra.mrb[0].mxu1 %v1940_v34  ;;  %976 = vmatprep.mubr.bf16.mxu0 %v1943_v36 }
  0x2a   : > { %1137 = vmatprep.mubr.bf16.mxu1 %v1945_v37 }
  0x30   : > { %977 = vmatmul.mubr.bf16.gmra.mrb[4].mxu0 %v1947_v38 }
  0x31   : > { %1138 = vmatmul.mubr.bf16.gmra.mrb[4].mxu1 %v1948_v39  ;;  %984 = vmatprep.mubr.bf16.mxu0 %v1949_v40 }
  0x32   : > { %1145 = vmatprep.mubr.bf16.mxu1 %v1951_v41  ;;  %v2269_v41 = vld [vmem:[%s2351_s1] ss:$0 sm:$0xff] }
  0x38   : > { %985 = vmatmul.mubr.bf16.gmra.mrb[8].mxu0 %v1953_v42 }
  0x39   : > { %1146 = vmatmul.mubr.bf16.gmra.mrb[8].mxu1 %v1954_v43  ;;  %992 = vmatprep.mubr.bf16.mxu0 %v1955_v44 }
  0x3a   : > { %1153 = vmatprep.mubr.bf16.mxu1 %v1957_v45 }
  0x40   : > { %993 = vmatmul.mubr.bf16.gmra.mrb[12].mxu0 %v1959_v46 }
  0x41   : > { %1154 = vmatmul.mubr.bf16.gmra.mrb[12].mxu1 %v1960_v47  ;;  %1000 = vmatprep.mubr.bf16.mxu0 %v1961_v48 }
  0x42   : > { %1161 = vmatprep.mubr.bf16.mxu1 %v1963_v49 }
  0x48   : > { %1001 = vmatmul.mubr.bf16.gmra.mrb[16].mxu0 %v1965_v50 }
  0x49   : > { %1162 = vmatmul.mubr.bf16.gmra.mrb[16].mxu1 %v1966_v51  ;;  %1008 = vmatprep.mubr.bf16.mxu0 %v1967_v52 }
  0x4a   : > { %1169 = vmatprep.mubr.bf16.mxu1 %v1969_v53 }
  0x50   : > { %1009 = vmatmul.mubr.bf16.gmra.mrb[20].mxu0 %v1971_v54 }
  0x51   : > { %1170 = vmatmul.mubr.bf16.gmra.mrb[20].mxu1 %v1972_v55  ;;  %1016 = vmatprep.mubr.bf16.mxu0 %v1973_v56 }
  0x52   : > { %1177 = vmatprep.mubr.bf16.mxu1 %v1975_v57 }
  0x58   : > { %1017 = vmatmul.mubr.bf16.gmra.mrb[24].mxu0 %v1977_v58 }
  0x59   : > { %1178 = vmatmul.mubr.bf16.gmra.mrb[24].mxu1 %v1978_v59  ;;  %1024 = vmatprep.mubr.bf16.mxu0 %v1979_v60 }
  0x5a   : > { %1185 = vmatprep.mubr.bf16.mxu1 %v1981_v61 }
  0x60   : > { %1025 = vmatmul.mubr.bf16.gmra.mrb[28].mxu0 %v1983_v62 }
  0x61   : > { %1186 = vmatmul.mubr.bf16.gmra.mrb[28].mxu1 %v1984_v63  ;;  %1032 = vmatprep.mubr.bf16.mxu0 %v1985_v0 }
  0x62   : > { %1193 = vmatprep.mubr.bf16.mxu1 %v1987_v1 }
  0x68   : > { %1033 = vmatmul.mubr.bf16.gmra.mrb[32].mxu0 %v1989_v2 }
  0x69   : > { %1194 = vmatmul.mubr.bf16.gmra.mrb[32].mxu1 %v1990_v3  ;;  %1040 = vmatprep.mubr.bf16.mxu0 %v1991_v4 }
  0x6a   : > { %1201 = vmatprep.mubr.bf16.mxu1 %v1993_v5 }
  0x70   : > { %1041 = vmatmul.mubr.bf16.gmra.mrb[36].mxu0 %v1995_v6 }
  0x71   : > { %1202 = vmatmul.mubr.bf16.gmra.mrb[36].mxu1 %v1996_v7  ;;  %1048 = vmatprep.mubr.bf16.mxu0 %v1997_v8 }
  0x72   : > { %1209 = vmatprep.mubr.bf16.mxu1 %v1999_v9 }
  0x78   : > { %1049 = vmatmul.mubr.bf16.gmra.mrb[40].mxu0 %v2001_v10 }
  0x79   : > { %1210 = vmatmul.mubr.bf16.gmra.mrb[40].mxu1 %v2002_v11  ;;  %1056 = vmatprep.mubr.bf16.mxu0 %v2003_v12 }
  0x7a   : > { %1217 = vmatprep.mubr.bf16.mxu1 %v2005_v13 }
  0x80   : > { %1057 = vmatmul.mubr.bf16.gmra.mrb[44].mxu0 %v2007_v14 }
  0x81   : > { %1218 = vmatmul.mubr.bf16.gmra.mrb[44].mxu1 %v2008_v15  ;;  %1064 = vmatprep.mubr.bf16.mxu0 %v2009_v16 }
  0x82   : > { %1225 = vmatprep.mubr.bf16.mxu1 %v2011_v17 }
  0x88   : > { %1065 = vmatmul.mubr.bf16.gmra.mrb[48].mxu0 %v2013_v18 }
  0x89   : > { %1226 = vmatmul.mubr.bf16.gmra.mrb[48].mxu1 %v2014_v19  ;;  %1072 = vmatprep.mubr.bf16.mxu0 %v2015_v20 }
  0x8a   : > { %1233 = vmatprep.mubr.bf16.mxu1 %v2017_v21 }
  0x90   : > { %1073 = vmatmul.mubr.bf16.gmra.mrb[52].mxu0 %v2019_v22 }
  0x91   : > { %1234 = vmatmul.mubr.bf16.gmra.mrb[52].mxu1 %v2020_v23  ;;  %1080 = vmatprep.mubr.bf16.mxu0 %v2021_v24 }
  0x92   : > { %1241 = vmatprep.mubr.bf16.mxu1 %v2023_v25 }
  0x98   : > { %1081 = vmatmul.mubr.bf16.gmra.mrb[56].mxu0 %v2025_v26 }
  0x99   : > { %1242 = vmatmul.mubr.bf16.gmra.mrb[56].mxu1 %v2026_v27  ;;  %1088 = vmatprep.mubr.bf16.mxu0 %v2027_v28 }
  0x9a   : > { %1249 = vmatprep.mubr.bf16.mxu1 %v2029_v29 }
  0xa0   : > { %1089 = vmatmul.mubr.bf16.gmra.mrb[60].mxu0 %v2031_v30 }
  0xa1   : > { %1250 = vmatmul.mubr.bf16.gmra.mrb[60].mxu1 %v2032_v31 }
  0xfb   : > { %v1673_v32 = vpop.f32.mrb[0].mxu0 }
  0xfc   : > { %v1785_v33 = vpop.f32.mrb[0].mxu1  ;;  %v1674_v34 = vpop.f32.mrb[1].mxu0 }
  0xfd   : > { %v1675_v35 = vadd.f32 %v1674_v34, %v1673_v32  ;;  %v1786_v36 = vpop.f32.mrb[1].mxu1  ;;  %v1676_v37 = vpop.f32.mrb[2].mxu0 }
  0xfe   : > { %v1787_v38 = vadd.f32 %v1786_v36, %v1785_v33  ;;  %v1788_v39 = vpop.f32.mrb[2].mxu1  ;;  %v1677_v40 = vpop.f32.mrb[3].mxu0 }
  0xff   : > { %v1678_v42 = vadd.f32 %v1677_v40, %v1676_v37  ;;  %v1789_v43 = vpop.f32.mrb[3].mxu1 }
 0x100   : > { %v1132_v44 = vadd.f32 %v1787_v38, %v1675_v35  ;;  %v1790_v45 = vadd.f32 %v1789_v43, %v1788_v39 }
 0x102   : > { %v1364_v46 = vadd.f32 %v2269_v41, %v1132_v44  ;;  %v1135_v47 = vadd.f32 %v1790_v45, %v1678_v42 }
 0x103   : > { %v1679_v48 = vpop.f32.mrb[4].mxu0 }
 0x104   : > { %v1396_v49 = vmax.f32 %v1364_v46, 0.0  ;;  %v1365_v50 = vadd.f32 %v2269_v41, %v1135_v47  ;;  %v1791_v51 = vpop.f32.mrb[4].mxu1  ;;  %v1680_v52 = vpop.f32.mrb[5].mxu0 }
 0x105   : > { %v1681_v53 = vadd.f32 %v1680_v52, %v1679_v48  ;;  %v1792_v54 = vpop.f32.mrb[5].mxu1  ;;  %v1682_v55 = vpop.f32.mrb[6].mxu0 }
 0x106   : > { %1428 = vst [vmem:[%s2276_s20] sm:$0xff] %v1396_v49  ;;  %v1397_v56 = vmax.f32 %v1365_v50, 0.0  ;;  %v1793_v57 = vadd.f32 %v1792_v54, %v1791_v51  ;;  %v1794_v58 = vpop.f32.mrb[6].mxu1  ;;  %v1683_v59 = vpop.f32.mrb[7].mxu0 }
 0x107   : > { %v1684_v60 = vadd.f32 %v1683_v59, %v1682_v55  ;;  %v1795_v61 = vpop.f32.mrb[7].mxu1 }
 0x108   : > { %1429 = vst [vmem:[%s2276_s20 + $0x8] sm:$0xff] %v1397_v56  ;;  %v1140_v62 = vadd.f32 %v1793_v57, %v1681_v53  ;;  %v1796_v63 = vadd.f32 %v1795_v61, %v1794_v58 }
 0x10a   : > { %v1366_v0 = vadd.f32 %v2269_v41, %v1140_v62  ;;  %v1143_v1 = vadd.f32 %v1796_v63, %v1684_v60 }
 0x10b   : > { %v1685_v2 = vpop.f32.mrb[8].mxu0 }
 0x10c   : > { %v1398_v3 = vmax.f32 %v1366_v0, 0.0  ;;  %v1367_v4 = vadd.f32 %v2269_v41, %v1143_v1  ;;  %v1797_v5 = vpop.f32.mrb[8].mxu1  ;;  %v1686_v6 = vpop.f32.mrb[9].mxu0 }
 0x10d   : > { %v1687_v7 = vadd.f32 %v1686_v6, %v1685_v2  ;;  %v1798_v8 = vpop.f32.mrb[9].mxu1  ;;  %v1688_v9 = vpop.f32.mrb[10].mxu0 }
 0x10e   : > { %1430 = vst [vmem:[%s2276_s20 + $0x10] sm:$0xff] %v1398_v3  ;;  %v1399_v10 = vmax.f32 %v1367_v4, 0.0  ;;  %v1799_v11 = vadd.f32 %v1798_v8, %v1797_v5  ;;  %v1800_v12 = vpop.f32.mrb[10].mxu1  ;;  %v1689_v13 = vpop.f32.mrb[11].mxu0 }
 0x10f   : > { %v1690_v14 = vadd.f32 %v1689_v13, %v1688_v9  ;;  %v1801_v15 = vpop.f32.mrb[11].mxu1 }
 0x110   : > { %1431 = vst [vmem:[%s2276_s20 + $0x18] sm:$0xff] %v1399_v10  ;;  %v1148_v16 = vadd.f32 %v1799_v11, %v1687_v7  ;;  %v1802_v17 = vadd.f32 %v1801_v15, %v1800_v12 }
 0x112   : > { %v1368_v18 = vadd.f32 %v2269_v41, %v1148_v16  ;;  %v1151_v19 = vadd.f32 %v1802_v17, %v1690_v14 }
 0x113   : > { %v1691_v20 = vpop.f32.mrb[12].mxu0 }
 0x114   : > { %v1400_v21 = vmax.f32 %v1368_v18, 0.0  ;;  %v1369_v22 = vadd.f32 %v2269_v41, %v1151_v19  ;;  %v1803_v23 = vpop.f32.mrb[12].mxu1  ;;  %v1692_v24 = vpop.f32.mrb[13].mxu0 }
 0x115   : > { %v1693_v25 = vadd.f32 %v1692_v24, %v1691_v20  ;;  %v1804_v26 = vpop.f32.mrb[13].mxu1  ;;  %v1694_v27 = vpop.f32.mrb[14].mxu0 }
 0x116   : > { %1432 = vst [vmem:[%s2276_s20 + $0x20] sm:$0xff] %v1400_v21  ;;  %v1401_v28 = vmax.f32 %v1369_v22, 0.0  ;;  %v1805_v29 = vadd.f32 %v1804_v26, %v1803_v23  ;;  %v1806_v30 = vpop.f32.mrb[14].mxu1  ;;  %v1695_v31 = vpop.f32.mrb[15].mxu0 }
 0x117   : > { %v1696_v32 = vadd.f32 %v1695_v31, %v1694_v27  ;;  %v1807_v33 = vpop.f32.mrb[15].mxu1 }
 0x118   : > { %1433 = vst [vmem:[%s2276_s20 + $0x28] sm:$0xff] %v1401_v28  ;;  %v1156_v34 = vadd.f32 %v1805_v29, %v1693_v25  ;;  %v1808_v35 = vadd.f32 %v1807_v33, %v1806_v30 }
 0x11a   : > { %v1370_v36 = vadd.f32 %v2269_v41, %v1156_v34  ;;  %v1159_v37 = vadd.f32 %v1808_v35, %v1696_v32 }
 0x11b   : > { %v1697_v38 = vpop.f32.mrb[16].mxu0 }
 0x11c   : > { %v1402_v39 = vmax.f32 %v1370_v36, 0.0  ;;  %v1371_v40 = vadd.f32 %v2269_v41, %v1159_v37  ;;  %v1809_v42 = vpop.f32.mrb[16].mxu1  ;;  %v1698_v43 = vpop.f32.mrb[17].mxu0 }
 0x11d   : > { %v1699_v44 = vadd.f32 %v1698_v43, %v1697_v38  ;;  %v1810_v45 = vpop.f32.mrb[17].mxu1  ;;  %v1700_v46 = vpop.f32.mrb[18].mxu0 }
 0x11e   : > { %1434 = vst [vmem:[%s2276_s20 + $0x30] sm:$0xff] %v1402_v39  ;;  %v1403_v47 = vmax.f32 %v1371_v40, 0.0  ;;  %v1811_v48 = vadd.f32 %v1810_v45, %v1809_v42  ;;  %v1812_v49 = vpop.f32.mrb[18].mxu1  ;;  %v1701_v50 = vpop.f32.mrb[19].mxu0 }
 0x11f   : > { %v1702_v51 = vadd.f32 %v1701_v50, %v1700_v46  ;;  %v1813_v52 = vpop.f32.mrb[19].mxu1 }
 0x120   : > { %1435 = vst [vmem:[%s2276_s20 + $0x38] sm:$0xff] %v1403_v47  ;;  %v1164_v53 = vadd.f32 %v1811_v48, %v1699_v44  ;;  %v1814_v54 = vadd.f32 %v1813_v52, %v1812_v49 }
 0x122   : > { %v1372_v55 = vadd.f32 %v2269_v41, %v1164_v53  ;;  %v1167_v56 = vadd.f32 %v1814_v54, %v1702_v51 }
 0x123   : > { %v1703_v57 = vpop.f32.mrb[20].mxu0 }
 0x124   : > { %v1404_v58 = vmax.f32 %v1372_v55, 0.0  ;;  %v1373_v59 = vadd.f32 %v2269_v41, %v1167_v56  ;;  %v1815_v60 = vpop.f32.mrb[20].mxu1  ;;  %v1704_v61 = vpop.f32.mrb[21].mxu0 }
 0x125   : > { %v1705_v62 = vadd.f32 %v1704_v61, %v1703_v57  ;;  %v1816_v63 = vpop.f32.mrb[21].mxu1  ;;  %v1706_v0 = vpop.f32.mrb[22].mxu0 }
 0x126   : > { %1436 = vst [vmem:[%s2276_s20 + $0x40] sm:$0xff] %v1404_v58  ;;  %v1405_v1 = vmax.f32 %v1373_v59, 0.0  ;;  %v1817_v2 = vadd.f32 %v1816_v63, %v1815_v60  ;;  %v1818_v3 = vpop.f32.mrb[22].mxu1  ;;  %v1707_v4 = vpop.f32.mrb[23].mxu0 }
 0x127   : > { %v1708_v5 = vadd.f32 %v1707_v4, %v1706_v0  ;;  %v1819_v6 = vpop.f32.mrb[23].mxu1 }
 0x128   : > { %1437 = vst [vmem:[%s2276_s20 + $0x48] sm:$0xff] %v1405_v1  ;;  %v1172_v7 = vadd.f32 %v1817_v2, %v1705_v62  ;;  %v1820_v8 = vadd.f32 %v1819_v6, %v1818_v3 }
 0x12a   : > { %v1374_v9 = vadd.f32 %v2269_v41, %v1172_v7  ;;  %v1175_v10 = vadd.f32 %v1820_v8, %v1708_v5 }
 0x12b   : > { %v1709_v11 = vpop.f32.mrb[24].mxu0 }
 0x12c   : > { %v1406_v12 = vmax.f32 %v1374_v9, 0.0  ;;  %v1375_v13 = vadd.f32 %v2269_v41, %v1175_v10  ;;  %v1821_v14 = vpop.f32.mrb[24].mxu1  ;;  %v1710_v15 = vpop.f32.mrb[25].mxu0 }
 0x12d   : > { %v1711_v16 = vadd.f32 %v1710_v15, %v1709_v11  ;;  %v1822_v17 = vpop.f32.mrb[25].mxu1  ;;  %v1712_v18 = vpop.f32.mrb[26].mxu0 }
 0x12e   : > { %1438 = vst [vmem:[%s2276_s20 + $0x50] sm:$0xff] %v1406_v12  ;;  %v1407_v19 = vmax.f32 %v1375_v13, 0.0  ;;  %v1823_v20 = vadd.f32 %v1822_v17, %v1821_v14  ;;  %v1824_v21 = vpop.f32.mrb[26].mxu1  ;;  %v1713_v22 = vpop.f32.mrb[27].mxu0 }
 0x12f   : > { %v1714_v23 = vadd.f32 %v1713_v22, %v1712_v18  ;;  %v1825_v24 = vpop.f32.mrb[27].mxu1 }
 0x130   : > { %1439 = vst [vmem:[%s2276_s20 + $0x58] sm:$0xff] %v1407_v19  ;;  %v1180_v25 = vadd.f32 %v1823_v20, %v1711_v16  ;;  %v1826_v26 = vadd.f32 %v1825_v24, %v1824_v21 }
 0x132   : > { %v1376_v27 = vadd.f32 %v2269_v41, %v1180_v25  ;;  %v1183_v28 = vadd.f32 %v1826_v26, %v1714_v23 }
 0x133   : > { %v1715_v29 = vpop.f32.mrb[28].mxu0 }
 0x134   : > { %v1408_v30 = vmax.f32 %v1376_v27, 0.0  ;;  %v1377_v31 = vadd.f32 %v2269_v41, %v1183_v28  ;;  %v1827_v32 = vpop.f32.mrb[28].mxu1  ;;  %v1716_v33 = vpop.f32.mrb[29].mxu0 }
 0x135   : > { %v1717_v34 = vadd.f32 %v1716_v33, %v1715_v29  ;;  %v1828_v35 = vpop.f32.mrb[29].mxu1  ;;  %v1718_v36 = vpop.f32.mrb[30].mxu0 }
 0x136   : > { %1440 = vst [vmem:[%s2276_s20 + $0x60] sm:$0xff] %v1408_v30  ;;  %v1409_v37 = vmax.f32 %v1377_v31, 0.0  ;;  %v1829_v38 = vadd.f32 %v1828_v35, %v1827_v32  ;;  %v1830_v39 = vpop.f32.mrb[30].mxu1  ;;  %v1719_v40 = vpop.f32.mrb[31].mxu0 }
 0x137   : > { %v1720_v42 = vadd.f32 %v1719_v40, %v1718_v36  ;;  %v1831_v43 = vpop.f32.mrb[31].mxu1 }
 0x138   : > { %1441 = vst [vmem:[%s2276_s20 + $0x68] sm:$0xff] %v1409_v37  ;;  %v1188_v44 = vadd.f32 %v1829_v38, %v1717_v34  ;;  %v1832_v45 = vadd.f32 %v1831_v43, %v1830_v39 }
 0x13a   : > { %v1378_v46 = vadd.f32 %v2269_v41, %v1188_v44  ;;  %v1191_v47 = vadd.f32 %v1832_v45, %v1720_v42 }
 0x13b   : > { %v1721_v48 = vpop.f32.mrb[32].mxu0 }
 0x13c   : > { %v1410_v49 = vmax.f32 %v1378_v46, 0.0  ;;  %v1379_v50 = vadd.f32 %v2269_v41, %v1191_v47  ;;  %v1833_v51 = vpop.f32.mrb[32].mxu1  ;;  %v1722_v52 = vpop.f32.mrb[33].mxu0 }
 0x13d   : > { %v1723_v53 = vadd.f32 %v1722_v52, %v1721_v48  ;;  %v1834_v54 = vpop.f32.mrb[33].mxu1  ;;  %v1724_v55 = vpop.f32.mrb[34].mxu0 }
 0x13e   : > { %1442 = vst [vmem:[%s2276_s20 + $0x70] sm:$0xff] %v1410_v49  ;;  %v1411_v56 = vmax.f32 %v1379_v50, 0.0  ;;  %v1835_v57 = vadd.f32 %v1834_v54, %v1833_v51  ;;  %v1836_v58 = vpop.f32.mrb[34].mxu1  ;;  %v1725_v59 = vpop.f32.mrb[35].mxu0 }
 0x13f   : > { %v1726_v60 = vadd.f32 %v1725_v59, %v1724_v55  ;;  %v1837_v61 = vpop.f32.mrb[35].mxu1 }
 0x140   : > { %1443 = vst [vmem:[%s2276_s20 + $0x78] sm:$0xff] %v1411_v56  ;;  %v1196_v62 = vadd.f32 %v1835_v57, %v1723_v53  ;;  %v1838_v63 = vadd.f32 %v1837_v61, %v1836_v58 }
 0x142   : > { %v1380_v0 = vadd.f32 %v2269_v41, %v1196_v62  ;;  %v1199_v1 = vadd.f32 %v1838_v63, %v1726_v60 }
 0x143   : > { %v1727_v2 = vpop.f32.mrb[36].mxu0 }
 0x144   : > { %v1412_v3 = vmax.f32 %v1380_v0, 0.0  ;;  %v1381_v4 = vadd.f32 %v2269_v41, %v1199_v1  ;;  %v1839_v5 = vpop.f32.mrb[36].mxu1  ;;  %v1728_v6 = vpop.f32.mrb[37].mxu0 }
 0x145   : > { %v1729_v7 = vadd.f32 %v1728_v6, %v1727_v2  ;;  %v1840_v8 = vpop.f32.mrb[37].mxu1  ;;  %v1730_v9 = vpop.f32.mrb[38].mxu0 }
 0x146   : > { %1444 = vst [vmem:[%s2276_s20 + $0x80] sm:$0xff] %v1412_v3  ;;  %v1413_v10 = vmax.f32 %v1381_v4, 0.0  ;;  %v1841_v11 = vadd.f32 %v1840_v8, %v1839_v5  ;;  %v1842_v12 = vpop.f32.mrb[38].mxu1  ;;  %v1731_v13 = vpop.f32.mrb[39].mxu0 }
 0x147   : > { %v1732_v14 = vadd.f32 %v1731_v13, %v1730_v9  ;;  %v1843_v15 = vpop.f32.mrb[39].mxu1 }
 0x148   : > { %1445 = vst [vmem:[%s2276_s20 + $0x88] sm:$0xff] %v1413_v10  ;;  %v1204_v16 = vadd.f32 %v1841_v11, %v1729_v7  ;;  %v1844_v17 = vadd.f32 %v1843_v15, %v1842_v12 }
 0x14a   : > { %v1382_v18 = vadd.f32 %v2269_v41, %v1204_v16  ;;  %v1207_v19 = vadd.f32 %v1844_v17, %v1732_v14 }
 0x14b   : > { %v1733_v20 = vpop.f32.mrb[40].mxu0 }
 0x14c   : > { %v1414_v21 = vmax.f32 %v1382_v18, 0.0  ;;  %v1383_v22 = vadd.f32 %v2269_v41, %v1207_v19  ;;  %v1845_v23 = vpop.f32.mrb[40].mxu1  ;;  %v1734_v24 = vpop.f32.mrb[41].mxu0 }
 0x14d   : > { %v1735_v25 = vadd.f32 %v1734_v24, %v1733_v20  ;;  %v1846_v26 = vpop.f32.mrb[41].mxu1  ;;  %v1736_v27 = vpop.f32.mrb[42].mxu0 }
 0x14e   : > { %1446 = vst [vmem:[%s2276_s20 + $0x90] sm:$0xff] %v1414_v21  ;;  %v1415_v28 = vmax.f32 %v1383_v22, 0.0  ;;  %v1847_v29 = vadd.f32 %v1846_v26, %v1845_v23  ;;  %v1848_v30 = vpop.f32.mrb[42].mxu1  ;;  %v1737_v31 = vpop.f32.mrb[43].mxu0 }
 0x14f   : > { %v1738_v32 = vadd.f32 %v1737_v31, %v1736_v27  ;;  %v1849_v33 = vpop.f32.mrb[43].mxu1 }
 0x150   : > { %1447 = vst [vmem:[%s2276_s20 + $0x98] sm:$0xff] %v1415_v28  ;;  %v1212_v34 = vadd.f32 %v1847_v29, %v1735_v25  ;;  %v1850_v35 = vadd.f32 %v1849_v33, %v1848_v30 }
 0x152   : > { %v1384_v36 = vadd.f32 %v2269_v41, %v1212_v34  ;;  %v1215_v37 = vadd.f32 %v1850_v35, %v1738_v32 }
 0x153   : > { %v1739_v38 = vpop.f32.mrb[44].mxu0 }
 0x154   : > { %v1416_v39 = vmax.f32 %v1384_v36, 0.0  ;;  %v1385_v40 = vadd.f32 %v2269_v41, %v1215_v37  ;;  %v1851_v42 = vpop.f32.mrb[44].mxu1  ;;  %v1740_v43 = vpop.f32.mrb[45].mxu0 }
 0x155   : > { %v1741_v44 = vadd.f32 %v1740_v43, %v1739_v38  ;;  %v1852_v45 = vpop.f32.mrb[45].mxu1  ;;  %v1742_v46 = vpop.f32.mrb[46].mxu0 }
 0x156   : > { %1448 = vst [vmem:[%s2276_s20 + $0xa0] sm:$0xff] %v1416_v39  ;;  %v1417_v47 = vmax.f32 %v1385_v40, 0.0  ;;  %v1853_v48 = vadd.f32 %v1852_v45, %v1851_v42  ;;  %v1854_v49 = vpop.f32.mrb[46].mxu1  ;;  %v1743_v50 = vpop.f32.mrb[47].mxu0 }
 0x157   : > { %v1744_v51 = vadd.f32 %v1743_v50, %v1742_v46  ;;  %v1855_v52 = vpop.f32.mrb[47].mxu1 }
 0x158   : > { %1449 = vst [vmem:[%s2276_s20 + $0xa8] sm:$0xff] %v1417_v47  ;;  %v1220_v53 = vadd.f32 %v1853_v48, %v1741_v44  ;;  %v1856_v54 = vadd.f32 %v1855_v52, %v1854_v49 }
 0x15a   : > { %v1386_v55 = vadd.f32 %v2269_v41, %v1220_v53  ;;  %v1223_v56 = vadd.f32 %v1856_v54, %v1744_v51 }
 0x15b   : > { %v1745_v57 = vpop.f32.mrb[48].mxu0 }
 0x15c   : > { %v1418_v58 = vmax.f32 %v1386_v55, 0.0  ;;  %v1387_v59 = vadd.f32 %v2269_v41, %v1223_v56  ;;  %v1857_v60 = vpop.f32.mrb[48].mxu1  ;;  %v1746_v61 = vpop.f32.mrb[49].mxu0 }
 0x15d   : > { %v1747_v62 = vadd.f32 %v1746_v61, %v1745_v57  ;;  %v1858_v63 = vpop.f32.mrb[49].mxu1  ;;  %v1748_v0 = vpop.f32.mrb[50].mxu0 }
 0x15e   : > { %1450 = vst [vmem:[%s2276_s20 + $0xb0] sm:$0xff] %v1418_v58  ;;  %v1419_v1 = vmax.f32 %v1387_v59, 0.0  ;;  %v1859_v2 = vadd.f32 %v1858_v63, %v1857_v60  ;;  %v1860_v3 = vpop.f32.mrb[50].mxu1  ;;  %v1749_v4 = vpop.f32.mrb[51].mxu0 }
 0x15f   : > { %v1750_v5 = vadd.f32 %v1749_v4, %v1748_v0  ;;  %v1861_v6 = vpop.f32.mrb[51].mxu1 }
 0x160   : > { %1451 = vst [vmem:[%s2276_s20 + $0xb8] sm:$0xff] %v1419_v1  ;;  %v1228_v7 = vadd.f32 %v1859_v2, %v1747_v62  ;;  %v1862_v8 = vadd.f32 %v1861_v6, %v1860_v3 }
 0x162   : > { %v1388_v9 = vadd.f32 %v2269_v41, %v1228_v7  ;;  %v1231_v10 = vadd.f32 %v1862_v8, %v1750_v5 }
 0x163   : > { %v1751_v11 = vpop.f32.mrb[52].mxu0 }
 0x164   : > { %v1420_v12 = vmax.f32 %v1388_v9, 0.0  ;;  %v1389_v13 = vadd.f32 %v2269_v41, %v1231_v10  ;;  %v1863_v14 = vpop.f32.mrb[52].mxu1  ;;  %v1752_v15 = vpop.f32.mrb[53].mxu0 }
 0x165   : > { %v1753_v16 = vadd.f32 %v1752_v15, %v1751_v11  ;;  %v1864_v17 = vpop.f32.mrb[53].mxu1  ;;  %v1754_v18 = vpop.f32.mrb[54].mxu0 }
 0x166   : > { %1452 = vst [vmem:[%s2276_s20 + $0xc0] sm:$0xff] %v1420_v12  ;;  %v1421_v19 = vmax.f32 %v1389_v13, 0.0  ;;  %v1865_v20 = vadd.f32 %v1864_v17, %v1863_v14  ;;  %v1866_v21 = vpop.f32.mrb[54].mxu1  ;;  %v1755_v22 = vpop.f32.mrb[55].mxu0 }
 0x167   : > { %v1756_v23 = vadd.f32 %v1755_v22, %v1754_v18  ;;  %v1867_v24 = vpop.f32.mrb[55].mxu1 }
 0x168   : > { %1453 = vst [vmem:[%s2276_s20 + $0xc8] sm:$0xff] %v1421_v19  ;;  %v1236_v25 = vadd.f32 %v1865_v20, %v1753_v16  ;;  %v1868_v26 = vadd.f32 %v1867_v24, %v1866_v21 }
 0x16a   : > { %v1390_v27 = vadd.f32 %v2269_v41, %v1236_v25  ;;  %v1239_v28 = vadd.f32 %v1868_v26, %v1756_v23 }
 0x16b   : > { %v1757_v29 = vpop.f32.mrb[56].mxu0 }
 0x16c   : > { %v1422_v30 = vmax.f32 %v1390_v27, 0.0  ;;  %v1391_v31 = vadd.f32 %v2269_v41, %v1239_v28  ;;  %v1869_v32 = vpop.f32.mrb[56].mxu1  ;;  %v1758_v33 = vpop.f32.mrb[57].mxu0 }
 0x16d   : > { %v1759_v34 = vadd.f32 %v1758_v33, %v1757_v29  ;;  %v1870_v35 = vpop.f32.mrb[57].mxu1  ;;  %v1760_v36 = vpop.f32.mrb[58].mxu0 }
 0x16e   : > { %1454 = vst [vmem:[%s2276_s20 + $0xd0] sm:$0xff] %v1422_v30  ;;  %v1423_v37 = vmax.f32 %v1391_v31, 0.0  ;;  %v1871_v38 = vadd.f32 %v1870_v35, %v1869_v32  ;;  %v1872_v39 = vpop.f32.mrb[58].mxu1  ;;  %v1761_v40 = vpop.f32.mrb[59].mxu0 }
 0x16f   : > { %v1762_v42 = vadd.f32 %v1761_v40, %v1760_v36  ;;  %v1873_v43 = vpop.f32.mrb[59].mxu1 }
 0x170   : > { %1455 = vst [vmem:[%s2276_s20 + $0xd8] sm:$0xff] %v1423_v37  ;;  %v1244_v44 = vadd.f32 %v1871_v38, %v1759_v34  ;;  %v1874_v45 = vadd.f32 %v1873_v43, %v1872_v39 }
 0x172   : > { %v1392_v46 = vadd.f32 %v2269_v41, %v1244_v44  ;;  %v1247_v47 = vadd.f32 %v1874_v45, %v1762_v42 }
 0x173   : > { %v1763_v48 = vpop.f32.mrb[60].mxu0 }
 0x174   : > { %v1424_v49 = vmax.f32 %v1392_v46, 0.0  ;;  %v1393_v50 = vadd.f32 %v2269_v41, %v1247_v47  ;;  %v1875_v51 = vpop.f32.mrb[60].mxu1  ;;  %v1764_v52 = vpop.f32.mrb[61].mxu0 }
 0x175   : > { %v1765_v53 = vadd.f32 %v1764_v52, %v1763_v48  ;;  %v1876_v54 = vpop.f32.mrb[61].mxu1  ;;  %v1766_v55 = vpop.f32.mrb[62].mxu0 }
 0x176   : > { %1456 = vst [vmem:[%s2276_s20 + $0xe0] sm:$0xff] %v1424_v49  ;;  %v1425_v56 = vmax.f32 %v1393_v50, 0.0  ;;  %v1877_v57 = vadd.f32 %v1876_v54, %v1875_v51  ;;  %v1878_v58 = vpop.f32.mrb[62].mxu1  ;;  %v1767_v59 = vpop.f32.mrb[63].mxu0 }
 0x177   : > { %v1768_v60 = vadd.f32 %v1767_v59, %v1766_v55  ;;  %v1879_v61 = vpop.f32.mrb[63].mxu1 }
 0x178   : > { %1457 = vst [vmem:[%s2276_s20 + $0xe8] sm:$0xff] %v1425_v56  ;;  %v1252_v62 = vadd.f32 %v1877_v57, %v1765_v53  ;;  %v1880_v63 = vadd.f32 %v1879_v61, %v1878_v58 }
 0x17a   : > { %v1394_v0 = vadd.f32 %v2269_v41, %v1252_v62  ;;  %v1255_v1 = vadd.f32 %v1880_v63, %v1768_v60 }
 0x17c   : > { %v1426_v2 = vmax.f32 %v1394_v0, 0.0  ;;  %v1395_v3 = vadd.f32 %v2269_v41, %v1255_v1 }
 0x17e   : > { %1458 = vst [vmem:[%s2276_s20 + $0xf0] sm:$0xff] %v1426_v2  ;;  %v1427_v4 = vmax.f32 %v1395_v3, 0.0 }
 0x180   : > { %1459 = vst [vmem:[%s2276_s20 + $0xf8] sm:$0xff] %v1427_v4 }
 0x181 PF: > { %s13_s14 = sadd.s32 1, %s2055_s14   ;;  %s2354_s12 = smov %s2051_s13 }
 0x182   : > { %p10_p5 = scmp.ge.s32.totalorder %s13_s14, 4   ;;  %s2355_s13 = smov %s2357_s15 }
 0x184   :  { %12 = sbr.rel (!%p10_p5) target bundleno = 2 (0x2), region = 73 }

</bundles_post_ra>
